<compile_context>
chip_gen: v6e
topology: v6e:2x2x1
jax: 0.10.0
libtpu: 0.0.40
codegen_flags: <defaults>
</compile_context>

<pallas_src>
import functools

import jax
import jax.numpy as jnp
from jax.experimental import pallas as pl
from jax.experimental.pallas import tpu as pltpu

HIDDEN = 500
HIDDEN_PAD = 512   # lane-aligned hidden width
LANE = 128


def _round_up(x, m):
    return (x + m - 1) // m * m


def _oates_mlp_kernel(x_ref, w1_ref, b1_ref, w2_ref, b2_ref, w3_ref, b3_ref,
                      wo_ref, bo_ref, o_ref):
    # Dropout layers are identity in eval mode (not applied here).
    # Cast x to bf16 in-kernel (MXU operands bf16, f32 accumulation).
    x = x_ref[...].astype(jnp.bfloat16)
    # Layer 1: Linear(d_in_pad -> 512) + ReLU
    h = jnp.dot(x, w1_ref[...], preferred_element_type=jnp.float32)
    h = jnp.maximum(h + b1_ref[...], 0.0)
    # Layer 2: Linear(512 -> 512) + ReLU
    h = jnp.dot(h.astype(jnp.bfloat16), w2_ref[...],
                preferred_element_type=jnp.float32)
    h = jnp.maximum(h + b2_ref[...], 0.0)
    # Layer 3: Linear(512 -> 512) + ReLU
    h = jnp.dot(h.astype(jnp.bfloat16), w3_ref[...],
                preferred_element_type=jnp.float32)
    h = jnp.maximum(h + b3_ref[...], 0.0)
    # Output layer: Linear(512 -> out_pad) + Softmax over classes.
    logits = jnp.dot(h.astype(jnp.bfloat16), wo_ref[...],
                     preferred_element_type=jnp.float32) + bo_ref[...]
    m = jnp.max(logits, axis=-1, keepdims=True)
    e = jnp.exp(logits - m)                 # padded classes: exp(-1e9 - m) -> 0
    denom = jnp.sum(e, axis=-1, keepdims=True)
    # Exact f32 normalization (approx reciprocal broke sum-to-1 tolerance).
    o_ref[...] = (e / denom).astype(o_ref.dtype)


def _pick_batch_tiling(b, d_in_pad, out_pad, weight_bytes):
    """Pick (tile_b, b_pad) under a v7x-safe VMEM working budget."""
    # Per-row bytes of the double-buffered per-step streams (f32 x + f32 out).
    per_row = 2 * 4 * (d_in_pad + out_pad)
    budget = (56 << 20) - weight_bytes
    if budget > per_row * 16:
        cap = min(512, (budget // per_row) // 16 * 16)
    else:
        cap = 16
    cap = max(cap, 16)

    b16 = _round_up(b, 16)
    if b16 <= cap:
        if b16 >= 32:
            # >= 2 grid steps so "parallel" axis shards over v7x's two TCs.
            tile_b = _round_up(b16 // 2, 16)
        else:
            tile_b = b16
    else:
        tile_b = cap
    b_pad = _round_up(b, tile_b)
    return tile_b, b_pad


@functools.partial(jax.jit, static_argnames=("out_dim",))
def oates_mlp_classifier_forward(x, padded_params, *, out_dim):
    """x: (batch, in_dim, sample_size) f32 -> (batch, out_dim) f32 probs."""
    w1, b1, w2, b2, w3, b3, wo, bo = padded_params
    b = x.shape[0]
    x_flat = x.reshape(b, -1)          # same row-major flatten as nn.Flatten; f32
    d_in = x_flat.shape[1]
    d_in_pad = w1.shape[0]             # multiple of 128
    hid = w1.shape[1]                  # 512
    out_pad = bo.shape[1]              # multiple of 128

    weight_bytes = sum(int(p.size) * p.dtype.itemsize for p in padded_params)
    tile_b, b_pad = _pick_batch_tiling(b, d_in_pad, out_pad, weight_bytes)

    if b_pad != b or d_in_pad != d_in:
        x_flat = jnp.pad(x_flat, ((0, b_pad - b), (0, d_in_pad - d_in)))
    grid = (b_pad // tile_b,)

    # Weights/biases: whole-array VMEM residents (single copy, no re-DMA).
    resident = pl.BlockSpec(memory_space=pltpu.MemorySpace.VMEM)

    in_specs = [
        pl.BlockSpec((tile_b, d_in_pad), lambda i: (i, 0)),   # x tile, pipelined
        resident, resident,    # w1, b1
        resident, resident,    # w2, b2
        resident, resident,    # w3, b3
        resident, resident,    # wo, bo
    ]
    out_specs = pl.BlockSpec((tile_b, out_pad), lambda i: (i, 0))

    # VMEM budget: resident weights + double-buffered x/out tiles + hidden
    # activation temporaries + compiler headroom.
    act_bytes = 2 * tile_b * 4 * (d_in_pad + out_pad)
    hidden_tmp_bytes = 6 * tile_b * hid * 4
    vmem_limit = weight_bytes + act_bytes + hidden_tmp_bytes + (8 << 20)
    vmem_limit = int(min(max(vmem_limit, 32 << 20), 100 << 20))

    flops = 2 * b_pad * (d_in_pad * hid + 2 * hid * hid + hid * out_pad)
    bytes_accessed = int(b_pad * d_in_pad * 4 + weight_bytes + b_pad * out_pad * 4)
    cost = pl.CostEstimate(flops=int(flops),
                           transcendentals=int(b_pad * out_pad),
                           bytes_accessed=bytes_accessed)

    out = pl.pallas_call(
        _oates_mlp_kernel,
        out_shape=jax.ShapeDtypeStruct((b_pad, out_pad), jnp.float32),
        grid=grid,
        in_specs=in_specs,
        out_specs=out_specs,
        compiler_params=pltpu.CompilerParams(
            dimension_semantics=("parallel",),
            vmem_limit_bytes=vmem_limit),
        cost_estimate=cost,
    )(x_flat, w1, b1, w2, b2, w3, b3, wo, bo)

    return out[:b, :out_dim]


def init_params(key, in_dim, sample_size, out_dim):
    """Unpadded f32 params mimicking nn.Linear's U(-1/sqrt(fan_in), ...)."""
    d_in = in_dim * sample_size
    dims = [(d_in, HIDDEN), (HIDDEN, HIDDEN), (HIDDEN, HIDDEN), (HIDDEN, out_dim)]
    params = []
    for (fi, fo) in dims:
        key, kw, kb = jax.random.split(key, 3)
        bound = 1.0 / jnp.sqrt(float(fi))
        w = jax.random.uniform(kw, (fi, fo), jnp.float32, -bound, bound)
        bias = jax.random.uniform(kb, (1, fo), jnp.float32, -bound, bound)
        params += [w, bias]
    return tuple(params)


def prepare_params(params):
    """Pad to lane-aligned shapes, zero padding, bf16 weights / f32 biases."""
    w1, b1, w2, b2, w3, b3, wo, bo = params
    d_in = w1.shape[0]
    d_in_pad = _round_up(d_in, LANE)
    out_dim = wo.shape[1]
    out_pad = _round_up(out_dim, LANE)

    def pad2(a, rows, cols, fill=0.0):
        r, c = a.shape
        return jnp.pad(a, ((0, rows - r), (0, cols - c)), constant_values=fill)

    w1p = pad2(w1, d_in_pad, HIDDEN_PAD).astype(jnp.bfloat16)
    b1p = pad2(b1, 1, HIDDEN_PAD)
    w2p = pad2(w2, HIDDEN_PAD, HIDDEN_PAD).astype(jnp.bfloat16)
    b2p = pad2(b2, 1, HIDDEN_PAD)
    w3p = pad2(w3, HIDDEN_PAD, HIDDEN_PAD).astype(jnp.bfloat16)
    b3p = pad2(b3, 1, HIDDEN_PAD)
    wop = pad2(wo, HIDDEN_PAD, out_pad).astype(jnp.bfloat16)
    # Padded class logits get bias -1e9 so softmax assigns them exactly 0
    # probability (exp underflows in f32) without risking inf/NaN.
    bop = pad2(bo, 1, out_pad, fill=-1e9)
    return (w1p, b1p, w2p, b2p, w3p, b3p, wop, bop)


def reference_forward(x, params):
    """Pure-JAX f32 reference of the eval-mode classifier forward."""
    w1, b1, w2, b2, w3, b3, wo, bo = params
    h = x.reshape(x.shape[0], -1)
    h = jnp.maximum(h @ w1 + b1, 0.0)
    h = jnp.maximum(h @ w2 + b2, 0.0)
    h = jnp.maximum(h @ w3 + b3, 0.0)
    return jax.nn.softmax(h @ wo + bo, axis=1)


if __name__ == "__main__":
    batch, in_dim, sample_size, out_dim = 2, 4, 16, 10

    key = jax.random.PRNGKey(0)
    key, kx = jax.random.split(key)
    x = jax.random.normal(kx, (batch, in_dim, sample_size), jnp.float32)

    params = init_params(key, in_dim, sample_size, out_dim)
    padded_params = prepare_params(params)

    out = oates_mlp_classifier_forward(x, padded_params, out_dim=out_dim)
    out = jax.block_until_ready(out)

    ref = reference_forward(x, params)
    assert out.shape == (batch, out_dim)
    # Probabilities sum to 1 per row (exact f32 normalization in-kernel).
    assert jnp.allclose(jnp.sum(out, axis=1), 1.0, atol=1e-3)
    # bf16 matmul operands with f32 accumulation vs f32 reference.
    assert jnp.allclose(out, ref, atol=1e-2, rtol=1e-2), "mismatch vs reference"

    print("KERNEL_OK")
</pallas_src>

<mosaic_0001>
module attributes {stable_mosaic.version = 11 : i64} {
  func.func @_oates_mlp_kernel(%arg0: i32, %arg1: memref<16x128xf32, #tpu.memory_space<vmem>>, %arg2: memref<128x512xbf16, #tpu.memory_space<vmem>>, %arg3: memref<1x512xf32, #tpu.memory_space<vmem>>, %arg4: memref<512x512xbf16, #tpu.memory_space<vmem>>, %arg5: memref<1x512xf32, #tpu.memory_space<vmem>>, %arg6: memref<512x512xbf16, #tpu.memory_space<vmem>>, %arg7: memref<1x512xf32, #tpu.memory_space<vmem>>, %arg8: memref<512x128xbf16, #tpu.memory_space<vmem>>, %arg9: memref<1x128xf32, #tpu.memory_space<vmem>>, %arg10: memref<16x128xf32, #tpu.memory_space<vmem>>) attributes {dimension_semantics = [#tpu.dimension_semantics<parallel>], iteration_bounds = array<i64: 1>, scalar_prefetch = 0 : i64, scratch_operands = 0 : i64, tpu.core_type = #tpu.core_type<tc>, window_params = [{transform_indices = @transform_0, window_bounds = array<i64: 16, 128>}, {pipeline_mode = #tpu.pipeline_mode<synchronous>, transform_indices = @transform_1, window_bounds = array<i64: 128, 512>}, {pipeline_mode = #tpu.pipeline_mode<synchronous>, transform_indices = @transform_2, window_bounds = array<i64: 1, 512>}, {pipeline_mode = #tpu.pipeline_mode<synchronous>, transform_indices = @transform_3, window_bounds = array<i64: 512, 512>}, {pipeline_mode = #tpu.pipeline_mode<synchronous>, transform_indices = @transform_4, window_bounds = array<i64: 1, 512>}, {pipeline_mode = #tpu.pipeline_mode<synchronous>, transform_indices = @transform_5, window_bounds = array<i64: 512, 512>}, {pipeline_mode = #tpu.pipeline_mode<synchronous>, transform_indices = @transform_6, window_bounds = array<i64: 1, 512>}, {pipeline_mode = #tpu.pipeline_mode<synchronous>, transform_indices = @transform_7, window_bounds = array<i64: 512, 128>}, {pipeline_mode = #tpu.pipeline_mode<synchronous>, transform_indices = @transform_8, window_bounds = array<i64: 1, 128>}, {transform_indices = @transform_9, window_bounds = array<i64: 16, 128>}]} {
    %c0 = arith.constant 0 : index
    %c0_0 = arith.constant 0 : index
    %0 = vector.load %arg1[%c0, %c0_0] : memref<16x128xf32, #tpu.memory_space<vmem>>, vector<16x128xf32>
    %1 = arith.truncf %0 : vector<16x128xf32> to vector<16x128xbf16>
    %c0_1 = arith.constant 0 : index
    %c0_2 = arith.constant 0 : index
    %2 = vector.load %arg2[%c0_1, %c0_2] : memref<128x512xbf16, #tpu.memory_space<vmem>>, vector<128x512xbf16>
    %cst = arith.constant dense<0.000000e+00> : vector<16x512xf32>
    %3 = tpu.matmul %1, %2, %cst {dimension_numbers = #tpu.dot_dimension_numbers<[1], [0], [0], [1], [0, 0, 1, 1], [], []>} : vector<16x128xbf16>, vector<128x512xbf16>, vector<16x512xf32> -> vector<16x512xf32>
    %c0_3 = arith.constant 0 : index
    %c0_4 = arith.constant 0 : index
    %4 = vector.load %arg3[%c0_3, %c0_4] : memref<1x512xf32, #tpu.memory_space<vmem>>, vector<1x512xf32>
    %5 = vector.broadcast %4 : vector<1x512xf32> to vector<16x512xf32>
    %6 = arith.addf %3, %5 : vector<16x512xf32>
    %cst_5 = arith.constant 0.000000e+00 : f32
    %7 = vector.broadcast %cst_5 : f32 to vector<16x512xf32>
    %8 = arith.maximumf %6, %7 : vector<16x512xf32>
    %9 = arith.truncf %8 : vector<16x512xf32> to vector<16x512xbf16>
    %c0_6 = arith.constant 0 : index
    %c0_7 = arith.constant 0 : index
    %10 = vector.load %arg4[%c0_6, %c0_7] : memref<512x512xbf16, #tpu.memory_space<vmem>>, vector<512x512xbf16>
    %cst_8 = arith.constant dense<0.000000e+00> : vector<16x512xf32>
    %11 = tpu.matmul %9, %10, %cst_8 {dimension_numbers = #tpu.dot_dimension_numbers<[1], [0], [0], [1], [0, 0, 1, 1], [], []>} : vector<16x512xbf16>, vector<512x512xbf16>, vector<16x512xf32> -> vector<16x512xf32>
    %c0_9 = arith.constant 0 : index
    %c0_10 = arith.constant 0 : index
    %12 = vector.load %arg5[%c0_9, %c0_10] : memref<1x512xf32, #tpu.memory_space<vmem>>, vector<1x512xf32>
    %13 = vector.broadcast %12 : vector<1x512xf32> to vector<16x512xf32>
    %14 = arith.addf %11, %13 : vector<16x512xf32>
    %cst_11 = arith.constant 0.000000e+00 : f32
    %15 = vector.broadcast %cst_11 : f32 to vector<16x512xf32>
    %16 = arith.maximumf %14, %15 : vector<16x512xf32>
    %17 = arith.truncf %16 : vector<16x512xf32> to vector<16x512xbf16>
    %c0_12 = arith.constant 0 : index
    %c0_13 = arith.constant 0 : index
    %18 = vector.load %arg6[%c0_12, %c0_13] : memref<512x512xbf16, #tpu.memory_space<vmem>>, vector<512x512xbf16>
    %cst_14 = arith.constant dense<0.000000e+00> : vector<16x512xf32>
    %19 = tpu.matmul %17, %18, %cst_14 {dimension_numbers = #tpu.dot_dimension_numbers<[1], [0], [0], [1], [0, 0, 1, 1], [], []>} : vector<16x512xbf16>, vector<512x512xbf16>, vector<16x512xf32> -> vector<16x512xf32>
    %c0_15 = arith.constant 0 : index
    %c0_16 = arith.constant 0 : index
    %20 = vector.load %arg7[%c0_15, %c0_16] : memref<1x512xf32, #tpu.memory_space<vmem>>, vector<1x512xf32>
    %21 = vector.broadcast %20 : vector<1x512xf32> to vector<16x512xf32>
    %22 = arith.addf %19, %21 : vector<16x512xf32>
    %cst_17 = arith.constant 0.000000e+00 : f32
    %23 = vector.broadcast %cst_17 : f32 to vector<16x512xf32>
    %24 = arith.maximumf %22, %23 : vector<16x512xf32>
    %25 = arith.truncf %24 : vector<16x512xf32> to vector<16x512xbf16>
    %c0_18 = arith.constant 0 : index
    %c0_19 = arith.constant 0 : index
    %26 = vector.load %arg8[%c0_18, %c0_19] : memref<512x128xbf16, #tpu.memory_space<vmem>>, vector<512x128xbf16>
    %cst_20 = arith.constant dense<0.000000e+00> : vector<16x128xf32>
    %27 = tpu.matmul %25, %26, %cst_20 {dimension_numbers = #tpu.dot_dimension_numbers<[1], [0], [0], [1], [0, 0, 1, 1], [], []>} : vector<16x512xbf16>, vector<512x128xbf16>, vector<16x128xf32> -> vector<16x128xf32>
    %c0_21 = arith.constant 0 : index
    %c0_22 = arith.constant 0 : index
    %28 = vector.load %arg9[%c0_21, %c0_22] : memref<1x128xf32, #tpu.memory_space<vmem>>, vector<1x128xf32>
    %29 = vector.broadcast %28 : vector<1x128xf32> to vector<16x128xf32>
    %30 = arith.addf %27, %29 : vector<16x128xf32>
    %cst_23 = arith.constant dense<0xFF800000> : vector<16xf32>
    %31 = vector.multi_reduction <maximumf>, %30, %cst_23 [1] : vector<16x128xf32> to vector<16xf32>
    %32 = vector.shape_cast %31 : vector<16xf32> to vector<16x1xf32>
    %33 = vector.broadcast %32 : vector<16x1xf32> to vector<16x128xf32>
    %34 = arith.subf %30, %33 : vector<16x128xf32>
    %35 = math.exp %34 : vector<16x128xf32>
    %cst_24 = arith.constant dense<0.000000e+00> : vector<16xf32>
    %36 = vector.multi_reduction <add>, %35, %cst_24 [1] : vector<16x128xf32> to vector<16xf32>
    %37 = vector.shape_cast %36 : vector<16xf32> to vector<16x1xf32>
    %38 = vector.broadcast %37 : vector<16x1xf32> to vector<16x128xf32>
    %39 = arith.divf %35, %38 : vector<16x128xf32>
    %c0_25 = arith.constant 0 : index
    %c0_26 = arith.constant 0 : index
    %40 = vector.load %arg10[%c0_25, %c0_26] : memref<16x128xf32, #tpu.memory_space<vmem>>, vector<16x128xf32>
    tpu.vector_store %arg10[%c0_25, %c0_26], %39 {strides = array<i32>} : memref<16x128xf32, #tpu.memory_space<vmem>>, vector<16x128xf32>,
    return
  }
  func.func @transform_0(%arg0: i32) -> (i32, i32) {
    %c0_i32 = arith.constant 0 : i32
    %c0_i32_0 = arith.constant 0 : i32
    return %arg0, %c0_i32 : i32, i32
  }
  func.func @transform_1(%arg0: i32) -> (i32, i32) {
    %c0_i32 = arith.constant 0 : i32
    %c0_i32_0 = arith.constant 0 : i32
    %c0_i32_1 = arith.constant 0 : i32
    return %c0_i32, %c0_i32_0 : i32, i32
  }
  func.func @transform_2(%arg0: i32) -> (i32, i32) {
    %c0_i32 = arith.constant 0 : i32
    %c0_i32_0 = arith.constant 0 : i32
    %c0_i32_1 = arith.constant 0 : i32
    return %c0_i32, %c0_i32_0 : i32, i32
  }
  func.func @transform_3(%arg0: i32) -> (i32, i32) {
    %c0_i32 = arith.constant 0 : i32
    %c0_i32_0 = arith.constant 0 : i32
    %c0_i32_1 = arith.constant 0 : i32
    return %c0_i32, %c0_i32_0 : i32, i32
  }
  func.func @transform_4(%arg0: i32) -> (i32, i32) {
    %c0_i32 = arith.constant 0 : i32
    %c0_i32_0 = arith.constant 0 : i32
    %c0_i32_1 = arith.constant 0 : i32
    return %c0_i32, %c0_i32_0 : i32, i32
  }
  func.func @transform_5(%arg0: i32) -> (i32, i32) {
    %c0_i32 = arith.constant 0 : i32
    %c0_i32_0 = arith.constant 0 : i32
    %c0_i32_1 = arith.constant 0 : i32
    return %c0_i32, %c0_i32_0 : i32, i32
  }
  func.func @transform_6(%arg0: i32) -> (i32, i32) {
    %c0_i32 = arith.constant 0 : i32
    %c0_i32_0 = arith.constant 0 : i32
    %c0_i32_1 = arith.constant 0 : i32
    return %c0_i32, %c0_i32_0 : i32, i32
  }
  func.func @transform_7(%arg0: i32) -> (i32, i32) {
    %c0_i32 = arith.constant 0 : i32
    %c0_i32_0 = arith.constant 0 : i32
    %c0_i32_1 = arith.constant 0 : i32
    return %c0_i32, %c0_i32_0 : i32, i32
  }
  func.func @transform_8(%arg0: i32) -> (i32, i32) {
    %c0_i32 = arith.constant 0 : i32
    %c0_i32_0 = arith.constant 0 : i32
    %c0_i32_1 = arith.constant 0 : i32
    return %c0_i32, %c0_i32_0 : i32, i32
  }
  func.func @transform_9(%arg0: i32) -> (i32, i32) {
    %c0_i32 = arith.constant 0 : i32
    %c0_i32_0 = arith.constant 0 : i32
    return %arg0, %c0_i32 : i32, i32
  }
}

</mosaic_0001>

<bundles_post_ra>
// kernel: oates_mlp_classifier_forward.1
= control target key start
LH: loop header
LB: loop body
LE: loop exit
PB: predicated region body
PF: predicated region fallthrough
CT: control target
= control target key end

     0   :  { %14 = vsyncpa [#allocation3], 0  ;;  %s3792_s0 = inlined_call_operand.vmem [shape: f32[16,128], index: 0, kind: input, shape index: {}]   ;;  %s3793_s1 = inlined_call_operand.hbm [shape: bf16[128,512], index: 1, kind: input, shape index: {}]   ;;  %s3794_s2 = inlined_call_operand.vmem [shape: f32[1,512], index: 2, kind: input, shape index: {}]   ;;  %s3795_s3 = inlined_call_operand.hbm [shape: bf16[512,512], index: 3, kind: input, shape index: {}]   ;;  %s3796_s4 = inlined_call_operand.vmem [shape: f32[1,512], index: 4, kind: input, shape index: {}]   ;;  %s3797_s5 = inlined_call_operand.hbm [shape: bf16[512,512], index: 5, kind: input, shape index: {}]   ;;  %s3798_s6 = inlined_call_operand.vmem [shape: f32[1,512], index: 6, kind: input, shape index: {}]   ;;  %s3799_s7 = inlined_call_operand.hbm [shape: bf16[512,128], index: 7, kind: input, shape index: {}]   ;;  %s3800_s8 = inlined_call_operand.vmem [shape: f32[1,128], index: 8, kind: input, shape index: {}]   ;;  %s3801_s9 = inlined_call_operand.vmem [shape: f32[16,128], index: 9, kind: output, shape index: {}]  }
   0x1   :  { %15 = vsyncpa [#allocation5], 0 }
   0x2   :  { %16 = vsyncpa [#allocation8], 0  ;;  %s3655_s30 = smov [#allocation4]   ;;  %s3656_s11 = smov [#allocation2]  }
   0x3   :  { %s38_s10 = sshll.u32 %s3655_s30, 4  ;;  %s24_s12 = sshll.u32 %s3656_s11, 4  ;;  %s39_s10 = int_to_ptr.vmem [resolvable:$true] %s38_s10  ;;  %s25_s12 = int_to_ptr.vmem [resolvable:$true] %s24_s12 }
   0x4   :  { %s3577_s13 = scalar_lea.vmem %s39_s10, 16384  ;;  %p3582_p1 = scmp.lt.s32.totalorder %s39_s10, %s39_s10 }
   0x5   :  { %p3578_p0 = scmp.ne.s32.totalorder %s39_s10, %s3577_s13  ;;  %p3583_p2 = scmp.lt.s32.totalorder %s3577_s13, %s3577_s13 }
   0x7   :  { %p3584_p3 = por %p3583_p2, %p3582_p1 }
   0x9   :  { %p3585_p4 = pnand %p3584_p3, %p3578_p0 }
   0xb   :  { %3588 = shalt.err (!%p3585_p4)
}
   0xc   :  { %s3657_s14 = smov 256   ;;  %s3658_s15 = smov 16  }
   0xd   :  { %44 = dma.hbm_to_vmem [thread:$0]  %s3795_s3, 16384, %s39_s10, [#allocation5], %s3657_s14, %s3657_s14, %s3658_s15  }
   0xe   :  { %s3597_s18 = scalar_lea.vmem %s25_s12, 4096  ;;  %p3602_p6 = scmp.lt.s32.totalorder %s25_s12, %s25_s12 }
   0xf   :  { %p3598_p5 = scmp.ne.s32.totalorder %s25_s12, %s3597_s18  ;;  %p3603_p7 = scmp.lt.s32.totalorder %s3597_s18, %s3597_s18 }
  0x11   :  { %p3604_p8 = por %p3603_p7, %p3602_p6 }
  0x13   :  { %p3605_p9 = pnand %p3604_p8, %p3598_p5 }
  0x15   :  { %3608 = shalt.err (!%p3605_p9)
}
  0x16   :  { %30 = dma.hbm_to_vmem [thread:$0]  %s3793_s1, 4096, %s25_s12, [#allocation3], %s3657_s14, %s3657_s14, %s3658_s15  }
  0x17   :  { %s3659_s21 = smov [#allocation6]   ;;  %s3660_s23 = smov [#allocation7]  }
  0x18   :  { %s52_s22 = sshll.u32 %s3659_s21, 4  ;;  %s66_s24 = sshll.u32 %s3660_s23, 4  ;;  %s53_s22 = int_to_ptr.vmem [resolvable:$true] %s52_s22  ;;  %s67_s24 = int_to_ptr.vmem [resolvable:$true] %s66_s24 }
  0x19   :  { %s3617_s25 = scalar_lea.vmem %s53_s22, 16384  ;;  %p3622_p11 = scmp.lt.s32.totalorder %s53_s22, %s53_s22 }
  0x1a   :  { %p3618_p10 = scmp.ne.s32.totalorder %s53_s22, %s3617_s25  ;;  %p3623_p12 = scmp.lt.s32.totalorder %s3617_s25, %s3617_s25 }
  0x1c   :  { %p3624_p13 = por %p3623_p12, %p3622_p11 }
  0x1e   :  { %p3625_p0 = pnand %p3624_p13, %p3618_p10 }
  0x20   :  { %3628 = shalt.err (!%p3625_p0)
}
  0x21   :  { %58 = dma.hbm_to_vmem [thread:$0]  %s3797_s5, 16384, %s53_s22, [#allocation5], %s3657_s14, %s3657_s14, %s3658_s15  }
  0x22   :  { %s3637_s27 = scalar_lea.vmem %s67_s24, 4096  ;;  %p3642_p2 = scmp.lt.s32.totalorder %s67_s24, %s67_s24 }
  0x23   :  { %p3638_p1 = scmp.ne.s32.totalorder %s67_s24, %s3637_s27  ;;  %p3643_p3 = scmp.lt.s32.totalorder %s3637_s27, %s3637_s27 }
  0x25   :  { %p3644_p4 = por %p3643_p3, %p3642_p2 }
  0x27   :  { %p3645_p5 = pnand %p3644_p4, %p3638_p1 }
  0x29   :  { %3648 = shalt.err (!%p3645_p5)
}
  0x2a   :  { %s3661_s1 = smov 64   ;;  %s3662_s28 = smov 4  }
  0x2b   :  { %72 = dma.hbm_to_vmem [thread:$0]  %s3799_s7, 4096, %s67_s24, [#allocation8], %s3661_s1, %s3661_s1, %s3662_s28  }
  0x2c   :  { %3649 = dma.done.wait [#allocation3], 4096  }
  0x2d   :  { %3650 = vsyncadd [#allocation3], 4294963200 }
  0x2e   :  { %3651 = dma.done.wait [#allocation5], 32768  }
  0x2f   :  { %3652 = vsyncadd [#allocation5], 4294934528 }
  0x30   :  { %3653 = dma.done.wait [#allocation8], 4096  }
  0x31   :  { %3654 = vsyncadd [#allocation8], 4294963200  ;;  %v3663_v0 = vmov 0   ;;  %v3097_v1 = vld [vmem:[#allocation2 + $0xe4] ss:$16 sps:$4 sm:$0xff]   ;;  %v89_v34 = vld [vmem:[%s3792_s0 + $0x8] sm:$0xff] }
  0x32   :  { %337 = vmatprep.mubr.bf16.mxu0 %v3663_v0  ;;  %380 = vmatprep.mubr.bf16.mxu1 %v3663_v0  ;;  %v3099_v2 = vld [vmem:[#allocation2 + $0xec] ss:$16 sps:$4 sm:$0xff]   ;;  %v3101_v3 = vld [vmem:[#allocation2 + $0xe0] ss:$16 sps:$4 sm:$0xff]   ;;  %v3102_v4 = vld [vmem:[#allocation2 + $0xe8] ss:$16 sps:$4 sm:$0xff]  }
  0x33   :  { %305 = vmatprep.subr.bf16.mxu0 %v3097_v1  ;;  %348 = vmatprep.subr.bf16.mxu1 %v3099_v2  ;;  %v3103_v5 = vld [vmem:[#allocation2 + $0xc4] ss:$16 sps:$4 sm:$0xff]   ;;  %v3105_v6 = vld [vmem:[#allocation2 + $0xcc] ss:$16 sps:$4 sm:$0xff]   ;;  %v3107_v7 = vld [vmem:[#allocation2 + $0xc0] ss:$16 sps:$4 sm:$0xff]  }
  0x34   :  { %306 = vmatpush1.bf16.msra.mxu0 %v3101_v3  ;;  %349 = vmatpush1.bf16.msra.mxu1 %v3102_v4  ;;  %v3108_v8 = vld [vmem:[#allocation2 + $0xc8] ss:$16 sps:$4 sm:$0xff]   ;;  %v3109_v9 = vld [vmem:[#allocation2 + $0xa4] ss:$16 sps:$4 sm:$0xff]   ;;  %v3111_v10 = vld [vmem:[#allocation2 + $0xac] ss:$16 sps:$4 sm:$0xff]  }
  0x35   :  { %307 = vmatprep.subr.bf16.mxu0 %v3103_v5  ;;  %350 = vmatprep.subr.bf16.mxu1 %v3105_v6  ;;  %v3113_v11 = vld [vmem:[#allocation2 + $0xa0] ss:$16 sps:$4 sm:$0xff]   ;;  %v3114_v12 = vld [vmem:[#allocation2 + $0xa8] ss:$16 sps:$4 sm:$0xff]   ;;  %v3115_v13 = vld [vmem:[#allocation2 + $0x84] ss:$16 sps:$4 sm:$0xff]  }
  0x36   :  { %v3117_v14 = vld [vmem:[#allocation2 + $0x8c] ss:$16 sps:$4 sm:$0xff]   ;;  %v3119_v15 = vld [vmem:[#allocation2 + $0x80] ss:$16 sps:$4 sm:$0xff]   ;;  %v3120_v16 = vld [vmem:[#allocation2 + $0x88] ss:$16 sps:$4 sm:$0xff]  }
  0x37   :  { %v3121_v17 = vld [vmem:[#allocation2 + $0x64] ss:$16 sps:$4 sm:$0xff]   ;;  %v3123_v18 = vld [vmem:[#allocation2 + $0x6c] ss:$16 sps:$4 sm:$0xff]   ;;  %v3125_v19 = vld [vmem:[#allocation2 + $0x60] ss:$16 sps:$4 sm:$0xff]  }
  0x38   :  { %308 = vmatpush1.bf16.msra.mxu0 %v3107_v7  ;;  %351 = vmatpush1.bf16.msra.mxu1 %v3108_v8  ;;  %v3126_v20 = vld [vmem:[#allocation2 + $0x68] ss:$16 sps:$4 sm:$0xff]   ;;  %v3127_v21 = vld [vmem:[#allocation2 + $0x44] ss:$16 sps:$4 sm:$0xff]   ;;  %v3129_v22 = vld [vmem:[#allocation2 + $0x4c] ss:$16 sps:$4 sm:$0xff]  }
  0x39   :  { %309 = vmatprep.subr.bf16.mxu0 %v3109_v9  ;;  %352 = vmatprep.subr.bf16.mxu1 %v3111_v10  ;;  %v3131_v23 = vld [vmem:[#allocation2 + $0x40] ss:$16 sps:$4 sm:$0xff]   ;;  %v3132_v24 = vld [vmem:[#allocation2 + $0x48] ss:$16 sps:$4 sm:$0xff]   ;;  %v3133_v25 = vld [vmem:[#allocation2 + $0x24] ss:$16 sps:$4 sm:$0xff]  }
  0x3a   :  { %v3135_v26 = vld [vmem:[#allocation2 + $0x2c] ss:$16 sps:$4 sm:$0xff]   ;;  %v3137_v27 = vld [vmem:[#allocation2 + $0x20] ss:$16 sps:$4 sm:$0xff]   ;;  %v3138_v28 = vld [vmem:[#allocation2 + $0x28] ss:$16 sps:$4 sm:$0xff]  }
  0x3b   :  { %v3139_v29 = vld [vmem:[#allocation2 + $0x4] ss:$16 sps:$4 sm:$0xff]   ;;  %v3141_v30 = vld [vmem:[#allocation2 + $0xc] ss:$16 sps:$4 sm:$0xff]   ;;  %v3143_v31 = vld [vmem:[#allocation2] ss:$16 sps:$4 sm:$0xff]  }
  0x3c   :  { %310 = vmatpush1.bf16.msra.mxu0 %v3113_v11  ;;  %353 = vmatpush1.bf16.msra.mxu1 %v3114_v12  ;;  %v3144_v32 = vld [vmem:[#allocation2 + $0x8] ss:$16 sps:$4 sm:$0xff]   ;;  %v88_v33 = vld [vmem:[%s3792_s0] sm:$0xff] }
  0x3d   :  { %311 = vmatprep.subr.bf16.mxu0 %v3115_v13  ;;  %354 = vmatprep.subr.bf16.mxu1 %v3117_v14  ;;  %v3147_v35 = vld [vmem:[#allocation4 + $0xe4] ss:$16 sps:$4 sm:$0xff]   ;;  %v90_v37 = vpack.c.bf16 %v89_v34, %v88_v33  ;;  %v3145_v38 = vld [vmem:[#allocation4 + $0xe0] ss:$16 sps:$4 sm:$0xff]  }
  0x3e   :  { %v3150_v36 = vld [vmem:[#allocation4 + $0x2e4] ss:$16 sps:$4 sm:$0xff]   ;;  %v3148_v39 = vld [vmem:[#allocation4 + $0x2e0] ss:$16 sps:$4 sm:$0xff]  }
  0x3f   :  { %v3153_v40 = vld [vmem:[#allocation4 + $0xc4] ss:$16 sps:$4 sm:$0xff]   ;;  %v3151_v42 = vld [vmem:[#allocation4 + $0xc0] ss:$16 sps:$4 sm:$0xff]  }
  0x40   :  { %312 = vmatpush1.bf16.msra.mxu0 %v3119_v15  ;;  %355 = vmatpush1.bf16.msra.mxu1 %v3120_v16  ;;  %v3156_v41 = vld [vmem:[#allocation4 + $0x2c4] ss:$16 sps:$4 sm:$0xff]   ;;  %v3154_v43 = vld [vmem:[#allocation4 + $0x2c0] ss:$16 sps:$4 sm:$0xff]  }
  0x41   :  { %313 = vmatprep.subr.bf16.mxu0 %v3121_v17  ;;  %356 = vmatprep.subr.bf16.mxu1 %v3123_v18  ;;  %v3159_v44 = vld [vmem:[#allocation4 + $0xa4] ss:$16 sps:$4 sm:$0xff]   ;;  %v3157_v46 = vld [vmem:[#allocation4 + $0xa0] ss:$16 sps:$4 sm:$0xff]  }
  0x42   :  { %v3162_v45 = vld [vmem:[#allocation4 + $0x2a4] ss:$16 sps:$4 sm:$0xff]   ;;  %v3160_v47 = vld [vmem:[#allocation4 + $0x2a0] ss:$16 sps:$4 sm:$0xff]  }
  0x43   :  { %v3165_v48 = vld [vmem:[#allocation4 + $0x84] ss:$16 sps:$4 sm:$0xff]   ;;  %v3163_v50 = vld [vmem:[#allocation4 + $0x80] ss:$16 sps:$4 sm:$0xff]  }
  0x44   :  { %314 = vmatpush1.bf16.msra.mxu0 %v3125_v19  ;;  %357 = vmatpush1.bf16.msra.mxu1 %v3126_v20  ;;  %v3168_v49 = vld [vmem:[#allocation4 + $0x284] ss:$16 sps:$4 sm:$0xff]   ;;  %v3166_v51 = vld [vmem:[#allocation4 + $0x280] ss:$16 sps:$4 sm:$0xff]  }
  0x45   :  { %315 = vmatprep.subr.bf16.mxu0 %v3127_v21  ;;  %358 = vmatprep.subr.bf16.mxu1 %v3129_v22  ;;  %v3171_v52 = vld [vmem:[#allocation4 + $0x64] ss:$16 sps:$4 sm:$0xff]   ;;  %v3169_v54 = vld [vmem:[#allocation4 + $0x60] ss:$16 sps:$4 sm:$0xff]  }
  0x46   :  { %v3174_v53 = vld [vmem:[#allocation4 + $0x264] ss:$16 sps:$4 sm:$0xff]   ;;  %v3172_v55 = vld [vmem:[#allocation4 + $0x260] ss:$16 sps:$4 sm:$0xff]  }
  0x47   :  { %v3177_v56 = vld [vmem:[#allocation4 + $0x44] ss:$16 sps:$4 sm:$0xff]   ;;  %v3175_v58 = vld [vmem:[#allocation4 + $0x40] ss:$16 sps:$4 sm:$0xff]  }
  0x48   :  { %316 = vmatpush1.bf16.msra.mxu0 %v3131_v23  ;;  %359 = vmatpush1.bf16.msra.mxu1 %v3132_v24  ;;  %v3180_v57 = vld [vmem:[#allocation4 + $0x244] ss:$16 sps:$4 sm:$0xff]   ;;  %v3178_v59 = vld [vmem:[#allocation4 + $0x240] ss:$16 sps:$4 sm:$0xff]  }
  0x49   :  { %317 = vmatprep.subr.bf16.mxu0 %v3133_v25  ;;  %360 = vmatprep.subr.bf16.mxu1 %v3135_v26  ;;  %v3183_v60 = vld [vmem:[#allocation4 + $0x24] ss:$16 sps:$4 sm:$0xff]   ;;  %v3181_v62 = vld [vmem:[#allocation4 + $0x20] ss:$16 sps:$4 sm:$0xff]  }
  0x4a   :  { %v3186_v61 = vld [vmem:[#allocation4 + $0x224] ss:$16 sps:$4 sm:$0xff]   ;;  %v3184_v63 = vld [vmem:[#allocation4 + $0x220] ss:$16 sps:$4 sm:$0xff]  }
  0x4b   :  { %v3189_v0 = vld [vmem:[#allocation4 + $0x4] ss:$16 sps:$4 sm:$0xff]   ;;  %v3187_v2 = vld [vmem:[#allocation4] ss:$16 sps:$4 sm:$0xff]  }
  0x4c   :  { %318 = vmatpush1.bf16.msra.mxu0 %v3137_v27  ;;  %361 = vmatpush1.bf16.msra.mxu1 %v3138_v28  ;;  %v3192_v1 = vld [vmem:[#allocation4 + $0x204] ss:$16 sps:$4 sm:$0xff]   ;;  %v3190_v3 = vld [vmem:[#allocation4 + $0x200] ss:$16 sps:$4 sm:$0xff]  }
  0x4d   :  { %319 = vmatprep.subr.bf16.mxu0 %v3139_v29  ;;  %362 = vmatprep.subr.bf16.mxu1 %v3141_v30  ;;  %v3195_v4 = vld [vmem:[#allocation4 + $0x1e4] ss:$16 sps:$4 sm:$0xff]   ;;  %v3193_v6 = vld [vmem:[#allocation4 + $0x1e0] ss:$16 sps:$4 sm:$0xff]  }
  0x4e   :  { %v3198_v5 = vld [vmem:[#allocation4 + $0x3e4] ss:$16 sps:$4 sm:$0xff]   ;;  %v3196_v7 = vld [vmem:[#allocation4 + $0x3e0] ss:$16 sps:$4 sm:$0xff]  }
  0x4f   :  { %v3201_v8 = vld [vmem:[#allocation4 + $0x1c4] ss:$16 sps:$4 sm:$0xff]   ;;  %v3199_v10 = vld [vmem:[#allocation4 + $0x1c0] ss:$16 sps:$4 sm:$0xff]  }
  0x50   :  { %320 = vmatpush1.bf16.msra.mxu0 %v3143_v31  ;;  %363 = vmatpush1.bf16.msra.mxu1 %v3144_v32  ;;  %v3204_v9 = vld [vmem:[#allocation4 + $0x3c4] ss:$16 sps:$4 sm:$0xff]   ;;  %v3202_v11 = vld [vmem:[#allocation4 + $0x3c0] ss:$16 sps:$4 sm:$0xff]  }
  0x51   :  { %1193 = vmatprep.subr.bf16.mxu0 %v3147_v35  ;;  %1236 = vmatprep.subr.bf16.mxu1 %v3150_v36  ;;  %v3207_v12 = vld [vmem:[#allocation4 + $0x1a4] ss:$16 sps:$4 sm:$0xff]   ;;  %v3205_v14 = vld [vmem:[#allocation4 + $0x1a0] ss:$16 sps:$4 sm:$0xff]   ;;  %v3243_v36 = vld [vmem:[#allocation4 + $0xec] ss:$16 sps:$4 sm:$0xff]  }
  0x52   :  { %v3210_v13 = vld [vmem:[#allocation4 + $0x3a4] ss:$16 sps:$4 sm:$0xff]   ;;  %v3208_v15 = vld [vmem:[#allocation4 + $0x3a0] ss:$16 sps:$4 sm:$0xff]  }
  0x53   :  { %338 = vmatmul.mubr.bf16.vlgmr.msra.gmra.mxu0 %v90_v37  ;;  %381 = vmatmul.mubr.bf16.vlgmr.msra.gmra.mxu1 %v90_v37  ;;  %v3213_v16 = vld [vmem:[#allocation4 + $0x184] ss:$16 sps:$4 sm:$0xff]   ;;  %v3211_v18 = vld [vmem:[#allocation4 + $0x180] ss:$16 sps:$4 sm:$0xff]   ;;  %v3246_v37 = vld [vmem:[#allocation4 + $0x2ec] ss:$16 sps:$4 sm:$0xff]  }
  0x54   :  { %1194 = vmatpush1.bf16.msra.mxu0 %v3145_v38  ;;  %1237 = vmatpush1.bf16.msra.mxu1 %v3148_v39  ;;  %v3216_v17 = vld [vmem:[#allocation4 + $0x384] ss:$16 sps:$4 sm:$0xff]   ;;  %v3214_v19 = vld [vmem:[#allocation4 + $0x380] ss:$16 sps:$4 sm:$0xff]   ;;  %v125_v38 = vlaneseq }
  0x55   :  { %1195 = vmatprep.subr.bf16.mxu0 %v3153_v40  ;;  %1238 = vmatprep.subr.bf16.mxu1 %v3156_v41  ;;  %v3219_v20 = vld [vmem:[#allocation4 + $0x164] ss:$16 sps:$4 sm:$0xff]   ;;  %v3217_v22 = vld [vmem:[#allocation4 + $0x160] ss:$16 sps:$4 sm:$0xff]  }
  0x56   :  { %v3222_v21 = vld [vmem:[#allocation4 + $0x364] ss:$16 sps:$4 sm:$0xff]   ;;  %v3220_v23 = vld [vmem:[#allocation4 + $0x360] ss:$16 sps:$4 sm:$0xff]   ;;  %v126_v39 = vshrl.u32 %v125_v38, 7 }
  0x57   :  { %v3225_v24 = vld [vmem:[#allocation4 + $0x144] ss:$16 sps:$4 sm:$0xff]   ;;  %v3223_v26 = vld [vmem:[#allocation4 + $0x140] ss:$16 sps:$4 sm:$0xff]   ;;  %v3280_v38 = vld [vmem:[#allocation4 + $0x228] ss:$16 sps:$4 sm:$0xff]  }
  0x58   :  { %1196 = vmatpush1.bf16.msra.mxu0 %v3151_v42  ;;  %1239 = vmatpush1.bf16.msra.mxu1 %v3154_v43  ;;  %v3228_v25 = vld [vmem:[#allocation4 + $0x344] ss:$16 sps:$4 sm:$0xff]   ;;  %v3226_v27 = vld [vmem:[#allocation4 + $0x340] ss:$16 sps:$4 sm:$0xff]   ;;  %v3732_v40 = vsub.s32 1, %v126_v39  ;;  %v3734_v41 = vsub.s32 3, %v126_v39 }
  0x59   :  { %1197 = vmatprep.subr.bf16.mxu0 %v3159_v44  ;;  %1240 = vmatprep.subr.bf16.mxu1 %v3162_v45  ;;  %v3231_v28 = vld [vmem:[#allocation4 + $0x124] ss:$16 sps:$4 sm:$0xff]   ;;  %v3229_v30 = vld [vmem:[#allocation4 + $0x120] ss:$16 sps:$4 sm:$0xff]   ;;  %v3736_v42 = vsub.s32 0, %v126_v39  ;;  %v3738_v43 = vsub.s32 2, %v126_v39 }
  0x5a   :  { %v3234_v29 = vld [vmem:[#allocation4 + $0x324] ss:$16 sps:$4 sm:$0xff]   ;;  %v3232_v31 = vld [vmem:[#allocation4 + $0x320] ss:$16 sps:$4 sm:$0xff]   ;;  %v3285_v39 = vld [vmem:[#allocation4 + $0xc] ss:$16 sps:$4 sm:$0xff]  }
  0x5b   :  { %v3237_v32 = vld [vmem:[#allocation4 + $0x104] ss:$16 sps:$4 sm:$0xff]   ;;  %v3235_v34 = vld [vmem:[#allocation4 + $0x100] ss:$16 sps:$4 sm:$0xff]  }
  0x5c   :  { %1198 = vmatpush1.bf16.msra.mxu0 %v3157_v46  ;;  %1241 = vmatpush1.bf16.msra.mxu1 %v3160_v47  ;;  %v3240_v33 = vld [vmem:[#allocation4 + $0x304] ss:$16 sps:$4 sm:$0xff]   ;;  %v3238_v35 = vld [vmem:[#allocation4 + $0x300] ss:$16 sps:$4 sm:$0xff]  }
  0x5d   :  { %1199 = vmatprep.subr.bf16.mxu0 %v3165_v48  ;;  %1242 = vmatprep.subr.bf16.mxu1 %v3168_v49  ;;  %v123_v44 = vld [vmem:[%s3794_s2] sm:$0xf] }
  0x5e   :  { %v132_v47 = vrot.slane %v123_v44, %v3732_v40  ;;  %v140_v48 = vrot.slane %v123_v44, %v3734_v41  ;;  %v128_v49 = vrot.slane %v123_v44, %v3736_v42 }
  0x60   :  { %1200 = vmatpush1.bf16.msra.mxu0 %v3163_v50  ;;  %1243 = vmatpush1.bf16.msra.mxu1 %v3166_v51  ;;  %v136_v50 = vrot.slane %v123_v44, %v3738_v43  ;;  %v3288_v44 = vld [vmem:[#allocation4 + $0x20c] ss:$16 sps:$4 sm:$0xff]  }
  0x61   :  { %1201 = vmatprep.subr.bf16.mxu0 %v3171_v52  ;;  %1244 = vmatprep.subr.bf16.mxu1 %v3174_v53 }
  0x64   :  { %1202 = vmatpush1.bf16.msra.mxu0 %v3169_v54  ;;  %1245 = vmatpush1.bf16.msra.mxu1 %v3172_v55 }
  0x65   :  { %1203 = vmatprep.subr.bf16.mxu0 %v3177_v56  ;;  %1246 = vmatprep.subr.bf16.mxu1 %v3180_v57 }
  0x68   :  { %1204 = vmatpush1.bf16.msra.mxu0 %v3175_v58  ;;  %1247 = vmatpush1.bf16.msra.mxu1 %v3178_v59 }
  0x69   :  { %1205 = vmatprep.subr.bf16.mxu0 %v3183_v60  ;;  %1248 = vmatprep.subr.bf16.mxu1 %v3186_v61 }
  0x6c   :  { %1206 = vmatpush1.bf16.msra.mxu0 %v3181_v62  ;;  %1249 = vmatpush1.bf16.msra.mxu1 %v3184_v63 }
  0x6d   :  { %1207 = vmatprep.subr.bf16.mxu0 %v3189_v0  ;;  %1250 = vmatprep.subr.bf16.mxu1 %v3192_v1 }
  0x70   :  { %1208 = vmatpush1.bf16.msra.mxu0 %v3187_v2  ;;  %1251 = vmatpush1.bf16.msra.mxu1 %v3190_v3 }
  0x71   :  { %1209 = vmatprep.subr.bf16.mxu0 %v3195_v4  ;;  %1252 = vmatprep.subr.bf16.mxu1 %v3198_v5 }
  0x74   :  { %1210 = vmatpush2.bf16.msra.mxu0 %v3193_v6  ;;  %1253 = vmatpush2.bf16.msra.mxu1 %v3196_v7 }
  0x75   :  { %1211 = vmatprep.subr.bf16.mxu0 %v3201_v8  ;;  %1254 = vmatprep.subr.bf16.mxu1 %v3204_v9 }
  0x78   :  { %1212 = vmatpush2.bf16.msra.mxu0 %v3199_v10  ;;  %1255 = vmatpush2.bf16.msra.mxu1 %v3202_v11  ;;  %v3241_v11 = vld [vmem:[#allocation4 + $0xe8] ss:$16 sps:$4 sm:$0xff]  }
  0x79   :  { %1213 = vmatprep.subr.bf16.mxu0 %v3207_v12  ;;  %1256 = vmatprep.subr.bf16.mxu1 %v3210_v13  ;;  %v3244_v12 = vld [vmem:[#allocation4 + $0x2e8] ss:$16 sps:$4 sm:$0xff]  }
  0x7c   :  { %1214 = vmatpush2.bf16.msra.mxu0 %v3205_v14  ;;  %1257 = vmatpush2.bf16.msra.mxu1 %v3208_v15  ;;  %v3249_v15 = vld [vmem:[#allocation4 + $0xcc] ss:$16 sps:$4 sm:$0xff]  }
  0x7d   :  { %1215 = vmatprep.subr.bf16.mxu0 %v3213_v16  ;;  %1258 = vmatprep.subr.bf16.mxu1 %v3216_v17  ;;  %v3252_v16 = vld [vmem:[#allocation4 + $0x2cc] ss:$16 sps:$4 sm:$0xff]   ;;  %v3247_v17 = vld [vmem:[#allocation4 + $0xc8] ss:$16 sps:$4 sm:$0xff]  }
  0x80   :  { %1216 = vmatpush2.bf16.msra.mxu0 %v3211_v18  ;;  %1259 = vmatpush2.bf16.msra.mxu1 %v3214_v19  ;;  %v3250_v18 = vld [vmem:[#allocation4 + $0x2c8] ss:$16 sps:$4 sm:$0xff]   ;;  %v3255_v19 = vld [vmem:[#allocation4 + $0xac] ss:$16 sps:$4 sm:$0xff]  }
  0x81   :  { %1217 = vmatprep.subr.bf16.mxu0 %v3219_v20  ;;  %1260 = vmatprep.subr.bf16.mxu1 %v3222_v21  ;;  %v3258_v20 = vld [vmem:[#allocation4 + $0x2ac] ss:$16 sps:$4 sm:$0xff]   ;;  %v3253_v21 = vld [vmem:[#allocation4 + $0xa8] ss:$16 sps:$4 sm:$0xff]  }
  0x84   :  { %1218 = vmatpush2.bf16.msra.mxu0 %v3217_v22  ;;  %1261 = vmatpush2.bf16.msra.mxu1 %v3220_v23  ;;  %v3256_v22 = vld [vmem:[#allocation4 + $0x2a8] ss:$16 sps:$4 sm:$0xff]   ;;  %v3261_v23 = vld [vmem:[#allocation4 + $0x8c] ss:$16 sps:$4 sm:$0xff]  }
  0x85   :  { %1219 = vmatprep.subr.bf16.mxu0 %v3225_v24  ;;  %1262 = vmatprep.subr.bf16.mxu1 %v3228_v25  ;;  %v3264_v24 = vld [vmem:[#allocation4 + $0x28c] ss:$16 sps:$4 sm:$0xff]   ;;  %v3259_v25 = vld [vmem:[#allocation4 + $0x88] ss:$16 sps:$4 sm:$0xff]  }
  0x88   :  { %1220 = vmatpush2.bf16.msra.mxu0 %v3223_v26  ;;  %1263 = vmatpush2.bf16.msra.mxu1 %v3226_v27  ;;  %v3262_v26 = vld [vmem:[#allocation4 + $0x288] ss:$16 sps:$4 sm:$0xff]   ;;  %v3267_v27 = vld [vmem:[#allocation4 + $0x6c] ss:$16 sps:$4 sm:$0xff]  }
  0x89   :  { %1221 = vmatprep.subr.bf16.mxu0 %v3231_v28  ;;  %1264 = vmatprep.subr.bf16.mxu1 %v3234_v29  ;;  %v3270_v28 = vld [vmem:[#allocation4 + $0x26c] ss:$16 sps:$4 sm:$0xff]   ;;  %v3265_v29 = vld [vmem:[#allocation4 + $0x68] ss:$16 sps:$4 sm:$0xff]  }
  0x8c   :  { %1222 = vmatpush2.bf16.msra.mxu0 %v3229_v30  ;;  %1265 = vmatpush2.bf16.msra.mxu1 %v3232_v31  ;;  %v3268_v30 = vld [vmem:[#allocation4 + $0x268] ss:$16 sps:$4 sm:$0xff]   ;;  %v3273_v31 = vld [vmem:[#allocation4 + $0x4c] ss:$16 sps:$4 sm:$0xff]  }
  0x8d   :  { %1223 = vmatprep.subr.bf16.mxu0 %v3237_v32  ;;  %1266 = vmatprep.subr.bf16.mxu1 %v3240_v33  ;;  %v3276_v32 = vld [vmem:[#allocation4 + $0x24c] ss:$16 sps:$4 sm:$0xff]   ;;  %v3271_v33 = vld [vmem:[#allocation4 + $0x48] ss:$16 sps:$4 sm:$0xff]  }
  0x90   :  { %1224 = vmatpush2.bf16.msra.mxu0 %v3235_v34  ;;  %1267 = vmatpush2.bf16.msra.mxu1 %v3238_v35  ;;  %v3274_v34 = vld [vmem:[#allocation4 + $0x248] ss:$16 sps:$4 sm:$0xff]   ;;  %v3279_v35 = vld [vmem:[#allocation4 + $0x2c] ss:$16 sps:$4 sm:$0xff]  }
  0x91   :  { %1279 = vmatprep.subr.bf16.mxu0 %v3243_v36  ;;  %1322 = vmatprep.subr.bf16.mxu1 %v3246_v37  ;;  %v3282_v36 = vld [vmem:[#allocation4 + $0x22c] ss:$16 sps:$4 sm:$0xff]   ;;  %v3277_v37 = vld [vmem:[#allocation4 + $0x28] ss:$16 sps:$4 sm:$0xff]  }
 0x113   :  { %v339_v45 = vpop.f32.mrf.mxu0  ;;  %v382_v46 = vpop.f32.mrf.mxu1 }
 0x114   :  { %v340_v59 = vadd.f32 %v339_v45, %v128_v49  ;;  %v383_v60 = vadd.f32 %v382_v46, %v136_v50  ;;  %v3283_v45 = vld [vmem:[#allocation4 + $0x8] ss:$16 sps:$4 sm:$0xff]  }
 0x115   :  { %v341_v51 = vpop.f32.mrf.mxu0  ;;  %v384_v52 = vpop.f32.mrf.mxu1  ;;  %v3286_v46 = vld [vmem:[#allocation4 + $0x208] ss:$16 sps:$4 sm:$0xff]  }
 0x116   :  { %v342_v55 = vadd.f32 %v341_v51, %v132_v47  ;;  %v385_v56 = vadd.f32 %v384_v52, %v140_v48  ;;  %v391_v7 = vmax.f32 %v340_v59, 0.0  ;;  %v393_v8 = vmax.f32 %v383_v60, 0.0  ;;  %v3297_v51 = vld [vmem:[#allocation4 + $0x1cc] ss:$16 sps:$4 sm:$0xff]  }
 0x117   :  { %v343_v53 = vpop.f32.mrf.mxu0  ;;  %v386_v54 = vpop.f32.mrf.mxu1  ;;  %v3300_v52 = vld [vmem:[#allocation4 + $0x3cc] ss:$16 sps:$4 sm:$0xff]  }
 0x118   :  { %v344_v57 = vadd.f32 %v343_v53, %v128_v49  ;;  %v387_v58 = vadd.f32 %v386_v54, %v136_v50  ;;  %v392_v3 = vmax.f32 %v342_v55, 0.0  ;;  %v394_v4 = vmax.f32 %v385_v56, 0.0  ;;  %v3289_v49 = vld [vmem:[#allocation4 + $0x1e8] ss:$16 sps:$4 sm:$0xff]   ;;  %v3303_v55 = vld [vmem:[#allocation4 + $0x1ac] ss:$16 sps:$4 sm:$0xff]  }
 0x119   :  { %v345_v61 = vpop.f32.mrf.mxu0  ;;  %v388_v62 = vpop.f32.mrf.mxu1  ;;  %v3292_v50 = vld [vmem:[#allocation4 + $0x3e8] ss:$16 sps:$4 sm:$0xff]   ;;  %v3306_v56 = vld [vmem:[#allocation4 + $0x3ac] ss:$16 sps:$4 sm:$0xff]  }
 0x11a   :  { %v346_v63 = vadd.f32 %v345_v61, %v132_v47  ;;  %v389_v0 = vadd.f32 %v388_v62, %v140_v48  ;;  %v395_v1 = vmax.f32 %v344_v57, 0.0  ;;  %v397_v2 = vmax.f32 %v387_v58, 0.0  ;;  %v3291_v47 = vld [vmem:[#allocation4 + $0x1ec] ss:$16 sps:$4 sm:$0xff]   ;;  %v3295_v53 = vld [vmem:[#allocation4 + $0x1c8] ss:$16 sps:$4 sm:$0xff]  }
 0x11b   :  { %v3294_v48 = vld [vmem:[#allocation4 + $0x3ec] ss:$16 sps:$4 sm:$0xff]   ;;  %v3298_v54 = vld [vmem:[#allocation4 + $0x3c8] ss:$16 sps:$4 sm:$0xff]  }
 0x11c   :  { %v396_v5 = vmax.f32 %v346_v63, 0.0  ;;  %v398_v6 = vmax.f32 %v389_v0, 0.0  ;;  %v3747_v13 = vpack.c.bf16 %v395_v1, %v391_v7  ;;  %v3749_v14 = vpack.c.bf16 %v397_v2, %v393_v8  ;;  %v3301_v57 = vld [vmem:[#allocation4 + $0x1a8] ss:$16 sps:$4 sm:$0xff]   ;;  %v3309_v59 = vld [vmem:[#allocation4 + $0x18c] ss:$16 sps:$4 sm:$0xff]  }
 0x11d   :  { %v3304_v58 = vld [vmem:[#allocation4 + $0x3a8] ss:$16 sps:$4 sm:$0xff]   ;;  %v3312_v60 = vld [vmem:[#allocation4 + $0x38c] ss:$16 sps:$4 sm:$0xff]  }
 0x11e   :  { %v400_v9 = vpack.c.bf16 %v396_v5, %v392_v3  ;;  %v402_v10 = vpack.c.bf16 %v398_v6, %v394_v4  ;;  %v3307_v61 = vld [vmem:[#allocation4 + $0x188] ss:$16 sps:$4 sm:$0xff]   ;;  %v3315_v63 = vld [vmem:[#allocation4 + $0x16c] ss:$16 sps:$4 sm:$0xff]  }
 0x11f   :  { %v3310_v62 = vld [vmem:[#allocation4 + $0x388] ss:$16 sps:$4 sm:$0xff]   ;;  %v3318_v0 = vld [vmem:[#allocation4 + $0x36c] ss:$16 sps:$4 sm:$0xff]  }
 0x120   :  { %1225 = vmatprep.mubr.bf16.mxu0 %v400_v9  ;;  %1268 = vmatprep.mubr.bf16.mxu1 %v402_v10  ;;  %v3313_v1 = vld [vmem:[#allocation4 + $0x168] ss:$16 sps:$4 sm:$0xff]   ;;  %v3321_v3 = vld [vmem:[#allocation4 + $0x14c] ss:$16 sps:$4 sm:$0xff]  }
 0x121   :  { %1226 = vmatmul.mubr.bf16.vlgmr.msra.gmra.mxu0 %v3747_v13  ;;  %1269 = vmatmul.mubr.bf16.vlgmr.msra.gmra.mxu1 %v3749_v14  ;;  %v3316_v2 = vld [vmem:[#allocation4 + $0x368] ss:$16 sps:$4 sm:$0xff]   ;;  %v3324_v4 = vld [vmem:[#allocation4 + $0x34c] ss:$16 sps:$4 sm:$0xff]  }
 0x122   :  { %1280 = vmatpush1.bf16.msra.mxu0 %v3241_v11  ;;  %1323 = vmatpush1.bf16.msra.mxu1 %v3244_v12  ;;  %v3319_v5 = vld [vmem:[#allocation4 + $0x148] ss:$16 sps:$4 sm:$0xff]   ;;  %v3327_v7 = vld [vmem:[#allocation4 + $0x12c] ss:$16 sps:$4 sm:$0xff]  }
 0x123   :  { %1311 = vmatprep.mubr.bf16.mxu0 %v400_v9  ;;  %1354 = vmatprep.mubr.bf16.mxu1 %v402_v10  ;;  %v3322_v6 = vld [vmem:[#allocation4 + $0x348] ss:$16 sps:$4 sm:$0xff]   ;;  %v3330_v8 = vld [vmem:[#allocation4 + $0x32c] ss:$16 sps:$4 sm:$0xff]  }
 0x124   :  { %1281 = vmatprep.subr.bf16.mxu0 %v3249_v15  ;;  %1324 = vmatprep.subr.bf16.mxu1 %v3252_v16  ;;  %v3325_v9 = vld [vmem:[#allocation4 + $0x128] ss:$16 sps:$4 sm:$0xff]   ;;  %v3333_v11 = vld [vmem:[#allocation4 + $0x10c] ss:$16 sps:$4 sm:$0xff]  }
 0x125   :  { %v3328_v10 = vld [vmem:[#allocation4 + $0x328] ss:$16 sps:$4 sm:$0xff]   ;;  %v3336_v12 = vld [vmem:[#allocation4 + $0x30c] ss:$16 sps:$4 sm:$0xff]  }
 0x126   :  { %1282 = vmatpush1.bf16.msra.mxu0 %v3247_v17  ;;  %1325 = vmatpush1.bf16.msra.mxu1 %v3250_v18  ;;  %v3331_v15 = vld [vmem:[#allocation4 + $0x108] ss:$16 sps:$4 sm:$0xff]   ;;  %v3339_v17 = vld [vmem:[#allocation6 + $0xe4] ss:$16 sps:$4 sm:$0xff]   ;;  %v3337_v18 = vld [vmem:[#allocation6 + $0xe0] ss:$16 sps:$4 sm:$0xff]  }
 0x127   :  { %1283 = vmatprep.subr.bf16.mxu0 %v3255_v19  ;;  %1326 = vmatprep.subr.bf16.mxu1 %v3258_v20  ;;  %v3334_v16 = vld [vmem:[#allocation4 + $0x308] ss:$16 sps:$4 sm:$0xff]   ;;  %v3342_v19 = vld [vmem:[#allocation6 + $0xc4] ss:$16 sps:$4 sm:$0xff]   ;;  %v3340_v20 = vld [vmem:[#allocation6 + $0xc0] ss:$16 sps:$4 sm:$0xff]  }
 0x12a   :  { %1284 = vmatpush1.bf16.msra.mxu0 %v3253_v21  ;;  %1327 = vmatpush1.bf16.msra.mxu1 %v3256_v22  ;;  %v3345_v21 = vld [vmem:[#allocation6 + $0xa4] ss:$16 sps:$4 sm:$0xff]   ;;  %v3343_v22 = vld [vmem:[#allocation6 + $0xa0] ss:$16 sps:$4 sm:$0xff]  }
 0x12b   :  { %1285 = vmatprep.subr.bf16.mxu0 %v3261_v23  ;;  %1328 = vmatprep.subr.bf16.mxu1 %v3264_v24  ;;  %v3348_v23 = vld [vmem:[#allocation6 + $0x84] ss:$16 sps:$4 sm:$0xff]   ;;  %v3346_v24 = vld [vmem:[#allocation6 + $0x80] ss:$16 sps:$4 sm:$0xff]  }
 0x12e   :  { %1286 = vmatpush1.bf16.msra.mxu0 %v3259_v25  ;;  %1329 = vmatpush1.bf16.msra.mxu1 %v3262_v26  ;;  %v3351_v25 = vld [vmem:[#allocation6 + $0x64] ss:$16 sps:$4 sm:$0xff]   ;;  %v3349_v26 = vld [vmem:[#allocation6 + $0x60] ss:$16 sps:$4 sm:$0xff]  }
 0x12f   :  { %1287 = vmatprep.subr.bf16.mxu0 %v3267_v27  ;;  %1330 = vmatprep.subr.bf16.mxu1 %v3270_v28  ;;  %v3385_v27 = vld [vmem:[#allocation6 + $0x2e0] ss:$16 sps:$4 sm:$0xff]   ;;  %v3387_v28 = vld [vmem:[#allocation6 + $0x2e4] ss:$16 sps:$4 sm:$0xff]  }
 0x132   :  { %1288 = vmatpush1.bf16.msra.mxu0 %v3265_v29  ;;  %1331 = vmatpush1.bf16.msra.mxu1 %v3268_v30  ;;  %v3391_v29 = vld [vmem:[#allocation6 + $0x2c0] ss:$16 sps:$4 sm:$0xff]   ;;  %v3393_v30 = vld [vmem:[#allocation6 + $0x2c4] ss:$16 sps:$4 sm:$0xff]  }
 0x133   :  { %1289 = vmatprep.subr.bf16.mxu0 %v3273_v31  ;;  %1332 = vmatprep.subr.bf16.mxu1 %v3276_v32  ;;  %v3357_v31 = vld [vmem:[#allocation6 + $0x24] ss:$16 sps:$4 sm:$0xff]   ;;  %v3355_v32 = vld [vmem:[#allocation6 + $0x20] ss:$16 sps:$4 sm:$0xff]  }
 0x136   :  { %1290 = vmatpush1.bf16.msra.mxu0 %v3271_v33  ;;  %1333 = vmatpush1.bf16.msra.mxu1 %v3274_v34  ;;  %v3397_v33 = vld [vmem:[#allocation6 + $0x2a0] ss:$16 sps:$4 sm:$0xff]   ;;  %v3399_v34 = vld [vmem:[#allocation6 + $0x2a4] ss:$16 sps:$4 sm:$0xff]  }
 0x137   :  { %1291 = vmatprep.subr.bf16.mxu0 %v3279_v35  ;;  %1334 = vmatprep.subr.bf16.mxu1 %v3282_v36  ;;  %v3360_v35 = vld [vmem:[#allocation6 + $0x4] ss:$16 sps:$4 sm:$0xff]   ;;  %v3358_v36 = vld [vmem:[#allocation6] ss:$16 sps:$4 sm:$0xff]  }
 0x13a   :  { %1292 = vmatpush1.bf16.msra.mxu0 %v3277_v37  ;;  %1335 = vmatpush1.bf16.msra.mxu1 %v3280_v38  ;;  %v3403_v37 = vld [vmem:[#allocation6 + $0x280] ss:$16 sps:$4 sm:$0xff]   ;;  %v3405_v38 = vld [vmem:[#allocation6 + $0x284] ss:$16 sps:$4 sm:$0xff]  }
 0x13b   :  { %1293 = vmatprep.subr.bf16.mxu0 %v3285_v39  ;;  %1336 = vmatprep.subr.bf16.mxu1 %v3288_v44  ;;  %v3363_v39 = vld [vmem:[#allocation6 + $0x1e4] ss:$16 sps:$4 sm:$0xff]   ;;  %v3361_v44 = vld [vmem:[#allocation6 + $0x1e0] ss:$16 sps:$4 sm:$0xff]  }
 0x13e   :  { %1294 = vmatpush1.bf16.msra.mxu0 %v3283_v45  ;;  %1337 = vmatpush1.bf16.msra.mxu1 %v3286_v46  ;;  %v3409_v45 = vld [vmem:[#allocation6 + $0x260] ss:$16 sps:$4 sm:$0xff]   ;;  %v3411_v46 = vld [vmem:[#allocation6 + $0x264] ss:$16 sps:$4 sm:$0xff]  }
 0x13f   :  { %1295 = vmatprep.subr.bf16.mxu0 %v3291_v47  ;;  %1338 = vmatprep.subr.bf16.mxu1 %v3294_v48  ;;  %v3366_v47 = vld [vmem:[#allocation6 + $0x1c4] ss:$16 sps:$4 sm:$0xff]   ;;  %v3364_v48 = vld [vmem:[#allocation6 + $0x1c0] ss:$16 sps:$4 sm:$0xff]  }
 0x142   :  { %1296 = vmatpush2.bf16.msra.mxu0 %v3289_v49  ;;  %1339 = vmatpush2.bf16.msra.mxu1 %v3292_v50  ;;  %v3415_v49 = vld [vmem:[#allocation6 + $0x240] ss:$16 sps:$4 sm:$0xff]   ;;  %v3417_v50 = vld [vmem:[#allocation6 + $0x244] ss:$16 sps:$4 sm:$0xff]  }
 0x143   :  { %1297 = vmatprep.subr.bf16.mxu0 %v3297_v51  ;;  %1340 = vmatprep.subr.bf16.mxu1 %v3300_v52  ;;  %v3369_v51 = vld [vmem:[#allocation6 + $0x1a4] ss:$16 sps:$4 sm:$0xff]   ;;  %v3367_v52 = vld [vmem:[#allocation6 + $0x1a0] ss:$16 sps:$4 sm:$0xff]  }
 0x146   :  { %1298 = vmatpush2.bf16.msra.mxu0 %v3295_v53  ;;  %1341 = vmatpush2.bf16.msra.mxu1 %v3298_v54  ;;  %v3421_v53 = vld [vmem:[#allocation6 + $0x220] ss:$16 sps:$4 sm:$0xff]   ;;  %v3423_v54 = vld [vmem:[#allocation6 + $0x224] ss:$16 sps:$4 sm:$0xff]  }
 0x147   :  { %1299 = vmatprep.subr.bf16.mxu0 %v3303_v55  ;;  %1342 = vmatprep.subr.bf16.mxu1 %v3306_v56  ;;  %v3372_v55 = vld [vmem:[#allocation6 + $0x184] ss:$16 sps:$4 sm:$0xff]   ;;  %v3370_v56 = vld [vmem:[#allocation6 + $0x180] ss:$16 sps:$4 sm:$0xff]  }
 0x14a   :  { %1300 = vmatpush2.bf16.msra.mxu0 %v3301_v57  ;;  %1343 = vmatpush2.bf16.msra.mxu1 %v3304_v58  ;;  %v3427_v57 = vld [vmem:[#allocation6 + $0x200] ss:$16 sps:$4 sm:$0xff]   ;;  %v3429_v58 = vld [vmem:[#allocation6 + $0x204] ss:$16 sps:$4 sm:$0xff]  }
 0x14b   :  { %1301 = vmatprep.subr.bf16.mxu0 %v3309_v59  ;;  %1344 = vmatprep.subr.bf16.mxu1 %v3312_v60  ;;  %v3375_v59 = vld [vmem:[#allocation6 + $0x164] ss:$16 sps:$4 sm:$0xff]   ;;  %v3373_v60 = vld [vmem:[#allocation6 + $0x160] ss:$16 sps:$4 sm:$0xff]  }
 0x14e   :  { %1302 = vmatpush2.bf16.msra.mxu0 %v3307_v61  ;;  %1345 = vmatpush2.bf16.msra.mxu1 %v3310_v62  ;;  %v3433_v61 = vld [vmem:[#allocation6 + $0x3e0] ss:$16 sps:$4 sm:$0xff]   ;;  %v3435_v62 = vld [vmem:[#allocation6 + $0x3e4] ss:$16 sps:$4 sm:$0xff]  }
 0x14f   :  { %1303 = vmatprep.subr.bf16.mxu0 %v3315_v63  ;;  %1346 = vmatprep.subr.bf16.mxu1 %v3318_v0  ;;  %v3378_v63 = vld [vmem:[#allocation6 + $0x144] ss:$16 sps:$4 sm:$0xff]   ;;  %v3376_v0 = vld [vmem:[#allocation6 + $0x140] ss:$16 sps:$4 sm:$0xff]  }
 0x152   :  { %1304 = vmatpush2.bf16.msra.mxu0 %v3313_v1  ;;  %1347 = vmatpush2.bf16.msra.mxu1 %v3316_v2  ;;  %v3439_v1 = vld [vmem:[#allocation6 + $0x3c0] ss:$16 sps:$4 sm:$0xff]   ;;  %v3441_v2 = vld [vmem:[#allocation6 + $0x3c4] ss:$16 sps:$4 sm:$0xff]  }
 0x153   :  { %1305 = vmatprep.subr.bf16.mxu0 %v3321_v3  ;;  %1348 = vmatprep.subr.bf16.mxu1 %v3324_v4  ;;  %v3381_v3 = vld [vmem:[#allocation6 + $0x124] ss:$16 sps:$4 sm:$0xff]   ;;  %v3379_v4 = vld [vmem:[#allocation6 + $0x120] ss:$16 sps:$4 sm:$0xff]  }
 0x156   :  { %1306 = vmatpush2.bf16.msra.mxu0 %v3319_v5  ;;  %1349 = vmatpush2.bf16.msra.mxu1 %v3322_v6  ;;  %v3445_v5 = vld [vmem:[#allocation6 + $0x3a0] ss:$16 sps:$4 sm:$0xff]   ;;  %v3447_v6 = vld [vmem:[#allocation6 + $0x3a4] ss:$16 sps:$4 sm:$0xff]  }
 0x157   :  { %1307 = vmatprep.subr.bf16.mxu0 %v3327_v7  ;;  %1350 = vmatprep.subr.bf16.mxu1 %v3330_v8  ;;  %v3384_v7 = vld [vmem:[#allocation6 + $0x104] ss:$16 sps:$4 sm:$0xff]   ;;  %v3382_v8 = vld [vmem:[#allocation6 + $0x100] ss:$16 sps:$4 sm:$0xff]  }
 0x15a   :  { %1308 = vmatpush2.bf16.msra.mxu0 %v3325_v9  ;;  %1351 = vmatpush2.bf16.msra.mxu1 %v3328_v10  ;;  %v3451_v9 = vld [vmem:[#allocation6 + $0x380] ss:$16 sps:$4 sm:$0xff]   ;;  %v3453_v10 = vld [vmem:[#allocation6 + $0x384] ss:$16 sps:$4 sm:$0xff]  }
 0x15b   :  { %1309 = vmatprep.subr.bf16.mxu0 %v3333_v11  ;;  %1352 = vmatprep.subr.bf16.mxu1 %v3336_v12  ;;  %v3390_v11 = vld [vmem:[#allocation6 + $0xec] ss:$16 sps:$4 sm:$0xff]   ;;  %v3457_v12 = vld [vmem:[#allocation6 + $0x360] ss:$16 sps:$4 sm:$0xff]  }
 0x15e   :  { %1310 = vmatpush2.bf16.msra.mxu0 %v3331_v15  ;;  %1353 = vmatpush2.bf16.msra.mxu1 %v3334_v16  ;;  %v3459_v15 = vld [vmem:[#allocation6 + $0x364] ss:$16 sps:$4 sm:$0xff]  }
 0x15f   :  { %2167 = vmatprep.subr.bf16.mxu0 %v3339_v17  ;;  %2210 = vmatprep.subr.bf16.mxu1 %v3387_v28  ;;  %v3465_v16 = vld [vmem:[#allocation6 + $0x344] ss:$16 sps:$4 sm:$0xff]   ;;  %v3463_v17 = vld [vmem:[#allocation6 + $0x340] ss:$16 sps:$4 sm:$0xff]  }
 0x161   :  { %1312 = vmatmul.mubr.bf16.vlgmr.msra.gmra.mxu0 %v3747_v13  ;;  %1355 = vmatmul.mubr.bf16.vlgmr.msra.gmra.mxu1 %v3749_v14  ;;  %v3354_v13 = vld [vmem:[#allocation6 + $0x44] ss:$16 sps:$4 sm:$0xff]   ;;  %v3352_v14 = vld [vmem:[#allocation6 + $0x40] ss:$16 sps:$4 sm:$0xff]  }
 0x162   :  { %2168 = vmatpush1.bf16.msra.mxu0 %v3337_v18  ;;  %2211 = vmatpush1.bf16.msra.mxu1 %v3385_v27  ;;  %v3471_v18 = vld [vmem:[#allocation6 + $0x324] ss:$16 sps:$4 sm:$0xff]  }
 0x163   :  { %2169 = vmatprep.subr.bf16.mxu0 %v3342_v19  ;;  %2212 = vmatprep.subr.bf16.mxu1 %v3393_v30  ;;  %v3469_v19 = vld [vmem:[#allocation6 + $0x320] ss:$16 sps:$4 sm:$0xff]  }
 0x166   :  { %2170 = vmatpush1.bf16.msra.mxu0 %v3340_v20  ;;  %2213 = vmatpush1.bf16.msra.mxu1 %v3391_v29  ;;  %v3477_v20 = vld [vmem:[#allocation6 + $0x304] ss:$16 sps:$4 sm:$0xff]  }
 0x167   :  { %2171 = vmatprep.subr.bf16.mxu0 %v3345_v21  ;;  %2214 = vmatprep.subr.bf16.mxu1 %v3399_v34  ;;  %v3475_v21 = vld [vmem:[#allocation6 + $0x300] ss:$16 sps:$4 sm:$0xff]  }
 0x16a   :  { %2172 = vmatpush1.bf16.msra.mxu0 %v3343_v22  ;;  %2215 = vmatpush1.bf16.msra.mxu1 %v3397_v33  ;;  %v3483_v22 = vld [vmem:[#allocation6 + $0x2ec] ss:$16 sps:$4 sm:$0xff]  }
 0x16b   :  { %2173 = vmatprep.subr.bf16.mxu0 %v3348_v23  ;;  %2216 = vmatprep.subr.bf16.mxu1 %v3405_v38  ;;  %v3758_v23 = vld [vmem:[%s3796_s4] sm:$0xf] }
 0x16e   :  { %2174 = vmatpush1.bf16.msra.mxu0 %v3346_v24  ;;  %2217 = vmatpush1.bf16.msra.mxu1 %v3403_v37  ;;  %v540_v24 = vrot.slane %v3758_v23, %v3732_v40 }
 0x16f   :  { %2175 = vmatprep.subr.bf16.mxu0 %v3351_v25  ;;  %2218 = vmatprep.subr.bf16.mxu1 %v3411_v46  ;;  %v536_v25 = vrot.slane %v3758_v23, %v3736_v42 }
 0x172   :  { %2176 = vmatpush1.bf16.msra.mxu0 %v3349_v26  ;;  %2219 = vmatpush1.bf16.msra.mxu1 %v3409_v45 }
 0x173   :  { %2177 = vmatprep.subr.bf16.mxu0 %v3354_v13  ;;  %2220 = vmatprep.subr.bf16.mxu1 %v3417_v50 }
 0x176   :  { %2178 = vmatpush1.bf16.msra.mxu0 %v3352_v14  ;;  %2221 = vmatpush1.bf16.msra.mxu1 %v3415_v49  ;;  %v3388_v49 = vld [vmem:[#allocation6 + $0xe8] ss:$16 sps:$4 sm:$0xff]  }
 0x177   :  { %2179 = vmatprep.subr.bf16.mxu0 %v3357_v31  ;;  %2222 = vmatprep.subr.bf16.mxu1 %v3423_v54  ;;  %v3400_v54 = vld [vmem:[#allocation6 + $0xa8] ss:$16 sps:$4 sm:$0xff]  }
 0x17a   :  { %2180 = vmatpush1.bf16.msra.mxu0 %v3355_v32  ;;  %2223 = vmatpush1.bf16.msra.mxu1 %v3421_v53  ;;  %v3402_v53 = vld [vmem:[#allocation6 + $0xac] ss:$16 sps:$4 sm:$0xff]  }
 0x17b   :  { %2181 = vmatprep.subr.bf16.mxu0 %v3360_v35  ;;  %2224 = vmatprep.subr.bf16.mxu1 %v3429_v58  ;;  %v3412_v58 = vld [vmem:[#allocation6 + $0x68] ss:$16 sps:$4 sm:$0xff]  }
 0x17e   :  { %2182 = vmatpush1.bf16.msra.mxu0 %v3358_v36  ;;  %2225 = vmatpush1.bf16.msra.mxu1 %v3427_v57  ;;  %v3414_v57 = vld [vmem:[#allocation6 + $0x6c] ss:$16 sps:$4 sm:$0xff]  }
 0x17f   :  { %2183 = vmatprep.subr.bf16.mxu0 %v3363_v39  ;;  %2226 = vmatprep.subr.bf16.mxu1 %v3435_v62  ;;  %v3424_v62 = vld [vmem:[#allocation6 + $0x28] ss:$16 sps:$4 sm:$0xff]  }
 0x182   :  { %2184 = vmatpush2.bf16.msra.mxu0 %v3361_v44  ;;  %2227 = vmatpush2.bf16.msra.mxu1 %v3433_v61  ;;  %v3426_v61 = vld [vmem:[#allocation6 + $0x2c] ss:$16 sps:$4 sm:$0xff]  }
 0x183   :  { %2185 = vmatprep.subr.bf16.mxu0 %v3366_v47  ;;  %2228 = vmatprep.subr.bf16.mxu1 %v3441_v2  ;;  %v3436_v2 = vld [vmem:[#allocation6 + $0x1e8] ss:$16 sps:$4 sm:$0xff]  }
 0x186   :  { %2186 = vmatpush2.bf16.msra.mxu0 %v3364_v48  ;;  %2229 = vmatpush2.bf16.msra.mxu1 %v3439_v1  ;;  %v3438_v1 = vld [vmem:[#allocation6 + $0x1ec] ss:$16 sps:$4 sm:$0xff]  }
 0x187   :  { %2187 = vmatprep.subr.bf16.mxu0 %v3369_v51  ;;  %2230 = vmatprep.subr.bf16.mxu1 %v3447_v6  ;;  %v3396_v51 = vld [vmem:[#allocation6 + $0xcc] ss:$16 sps:$4 sm:$0xff]   ;;  %v3448_v6 = vld [vmem:[#allocation6 + $0x1a8] ss:$16 sps:$4 sm:$0xff]  }
 0x18a   :  { %2188 = vmatpush2.bf16.msra.mxu0 %v3367_v52  ;;  %2231 = vmatpush2.bf16.msra.mxu1 %v3445_v5  ;;  %v3394_v52 = vld [vmem:[#allocation6 + $0xc8] ss:$16 sps:$4 sm:$0xff]   ;;  %v3450_v5 = vld [vmem:[#allocation6 + $0x1ac] ss:$16 sps:$4 sm:$0xff]  }
 0x18b   :  { %2189 = vmatprep.subr.bf16.mxu0 %v3372_v55  ;;  %2232 = vmatprep.subr.bf16.mxu1 %v3453_v10  ;;  %v3408_v55 = vld [vmem:[#allocation6 + $0x8c] ss:$16 sps:$4 sm:$0xff]   ;;  %v3460_v10 = vld [vmem:[#allocation6 + $0x168] ss:$16 sps:$4 sm:$0xff]  }
 0x18e   :  { %2190 = vmatpush2.bf16.msra.mxu0 %v3370_v56  ;;  %2233 = vmatpush2.bf16.msra.mxu1 %v3451_v9  ;;  %v3406_v56 = vld [vmem:[#allocation6 + $0x88] ss:$16 sps:$4 sm:$0xff]   ;;  %v3462_v9 = vld [vmem:[#allocation6 + $0x16c] ss:$16 sps:$4 sm:$0xff]  }
 0x18f   :  { %2191 = vmatprep.subr.bf16.mxu0 %v3375_v59  ;;  %2234 = vmatprep.subr.bf16.mxu1 %v3459_v15  ;;  %v3420_v59 = vld [vmem:[#allocation6 + $0x4c] ss:$16 sps:$4 sm:$0xff]   ;;  %v544_v15 = vrot.slane %v3758_v23, %v3738_v43 }
 0x192   :  { %2192 = vmatpush2.bf16.msra.mxu0 %v3373_v60  ;;  %2235 = vmatpush2.bf16.msra.mxu1 %v3457_v12  ;;  %v3418_v60 = vld [vmem:[#allocation6 + $0x48] ss:$16 sps:$4 sm:$0xff]   ;;  %v548_v12 = vrot.slane %v3758_v23, %v3734_v41 }
 0x193   :  { %2193 = vmatprep.subr.bf16.mxu0 %v3378_v63  ;;  %2236 = vmatprep.subr.bf16.mxu1 %v3465_v16  ;;  %v3432_v63 = vld [vmem:[#allocation6 + $0xc] ss:$16 sps:$4 sm:$0xff]  }
 0x196   :  { %2194 = vmatpush2.bf16.msra.mxu0 %v3376_v0  ;;  %2237 = vmatpush2.bf16.msra.mxu1 %v3463_v17  ;;  %v3430_v0 = vld [vmem:[#allocation6 + $0x8] ss:$16 sps:$4 sm:$0xff]  }
 0x197   :  { %2195 = vmatprep.subr.bf16.mxu0 %v3381_v3  ;;  %2238 = vmatprep.subr.bf16.mxu1 %v3471_v18  ;;  %v3444_v3 = vld [vmem:[#allocation6 + $0x1cc] ss:$16 sps:$4 sm:$0xff]   ;;  %v3466_v18 = vld [vmem:[#allocation6 + $0x148] ss:$16 sps:$4 sm:$0xff]  }
 0x19a   :  { %2196 = vmatpush2.bf16.msra.mxu0 %v3379_v4  ;;  %2239 = vmatpush2.bf16.msra.mxu1 %v3469_v19  ;;  %v3442_v4 = vld [vmem:[#allocation6 + $0x1c8] ss:$16 sps:$4 sm:$0xff]  }
 0x19b   :  { %2197 = vmatprep.subr.bf16.mxu0 %v3384_v7  ;;  %2240 = vmatprep.subr.bf16.mxu1 %v3477_v20  ;;  %v3456_v7 = vld [vmem:[#allocation6 + $0x18c] ss:$16 sps:$4 sm:$0xff]  }
 0x19e   :  { %2198 = vmatpush2.bf16.msra.mxu0 %v3382_v8  ;;  %2241 = vmatpush2.bf16.msra.mxu1 %v3475_v21  ;;  %v3454_v8 = vld [vmem:[#allocation6 + $0x188] ss:$16 sps:$4 sm:$0xff]   ;;  %v3474_v21 = vld [vmem:[#allocation6 + $0x12c] ss:$16 sps:$4 sm:$0xff]  }
 0x19f   :  { %2253 = vmatprep.subr.bf16.mxu0 %v3390_v11  ;;  %2296 = vmatprep.subr.bf16.mxu1 %v3483_v22  ;;  %v3468_v11 = vld [vmem:[#allocation6 + $0x14c] ss:$16 sps:$4 sm:$0xff]  }
 0x1e1   :  { %v1227_v26 = vpop.f32.mrf.mxu0  ;;  %v1270_v27 = vpop.f32.mrf.mxu1 }
 0x1e2   :  { %v1228_v29 = vadd.f32 %v1227_v26, %v536_v25 }
 0x1e3   :  { %v1229_v28 = vpop.f32.mrf.mxu0  ;;  %v1272_v13 = vpop.f32.mrf.mxu1 }
 0x1e4   :  { %v1230_v14 = vadd.f32 %v1229_v28, %v540_v24  ;;  %v1271_v37 = vadd.f32 %v1270_v27, %v1228_v29  ;;  %v3472_v28 = vld [vmem:[#allocation6 + $0x128] ss:$16 sps:$4 sm:$0xff]  }
 0x1e5   :  { %v1231_v30 = vpop.f32.mrf.mxu0  ;;  %v1274_v31 = vpop.f32.mrf.mxu1 }
 0x1e6   :  { %v1232_v32 = vadd.f32 %v1231_v30, %v536_v25  ;;  %v1273_v34 = vadd.f32 %v1272_v13, %v1230_v14  ;;  %v1365_v47 = vmax.f32 %v1271_v37, 0.0  ;;  %v3480_v14 = vld [vmem:[#allocation6 + $0x10c] ss:$16 sps:$4 sm:$0xff]  }
 0x1e7   :  { %v1233_v33 = vpop.f32.mrf.mxu0  ;;  %v1276_v38 = vpop.f32.mrf.mxu1 }
 0x1e8   :  { %v1275_v35 = vadd.f32 %v1274_v31, %v1232_v32  ;;  %v1234_v36 = vadd.f32 %v1233_v33, %v540_v24  ;;  %v1366_v45 = vmax.f32 %v1273_v34, 0.0  ;;  %v3478_v34 = vld [vmem:[#allocation6 + $0x108] ss:$16 sps:$4 sm:$0xff]  }
 0x1ea   :  { %v1277_v39 = vadd.f32 %v1276_v38, %v1234_v36  ;;  %v1369_v44 = vmax.f32 %v1275_v35, 0.0 }
 0x1ec   :  { %v1370_v46 = vmax.f32 %v1277_v39, 0.0  ;;  %v3764_v50 = vpack.c.bf16 %v1369_v44, %v1365_v47  ;;  %v3481_v44 = vld [vmem:[#allocation6 + $0x2e8] ss:$16 sps:$4 sm:$0xff]  }
 0x1ed   :  { %v3484_v47 = vld [vmem:[#allocation6 + $0x2c8] ss:$16 sps:$4 sm:$0xff]  }
 0x1ee   :  { %v1374_v48 = vpack.c.bf16 %v1370_v46, %v1366_v45  ;;  %v3486_v46 = vld [vmem:[#allocation6 + $0x2cc] ss:$16 sps:$4 sm:$0xff]  }
 0x1f0   :  { %2199 = vmatprep.mubr.bf16.mxu0 %v1374_v48 }
 0x1f1   :  { %2200 = vmatmul.mubr.bf16.vlgmr.msra.gmra.mxu0 %v3764_v50 }
 0x1f2   :  { %2254 = vmatpush1.bf16.msra.mxu0 %v3388_v49  ;;  %2285 = vmatprep.mubr.bf16.mxu0 %v1374_v48  ;;  %v3489_v48 = vld [vmem:[#allocation6 + $0x2ac] ss:$16 sps:$4 sm:$0xff]   ;;  %v3487_v49 = vld [vmem:[#allocation6 + $0x2a8] ss:$16 sps:$4 sm:$0xff]  }
 0x1f3   :  { %2255 = vmatprep.subr.bf16.mxu0 %v3396_v51  ;;  %v3492_v51 = vld [vmem:[#allocation6 + $0x28c] ss:$16 sps:$4 sm:$0xff]  }
 0x1f6   :  { %2256 = vmatpush1.bf16.msra.mxu0 %v3394_v52  ;;  %v3529_v52 = vld [vmem:[#allocation7 + $0x78] sm:$0xff]  }
 0x1f7   :  { %2257 = vmatprep.subr.bf16.mxu0 %v3402_v53  ;;  %v3530_v53 = vld [vmem:[#allocation7 + $0x38] sm:$0xff]  }
 0x1fa   :  { %2258 = vmatpush1.bf16.msra.mxu0 %v3400_v54  ;;  %v3531_v54 = vld [vmem:[#allocation7 + $0x70] sm:$0xff]  }
 0x1fb   :  { %2259 = vmatprep.subr.bf16.mxu0 %v3408_v55  ;;  %v3490_v55 = vld [vmem:[#allocation6 + $0x288] ss:$16 sps:$4 sm:$0xff]  }
 0x1fe   :  { %2260 = vmatpush1.bf16.msra.mxu0 %v3406_v56  ;;  %v3495_v56 = vld [vmem:[#allocation6 + $0x26c] ss:$16 sps:$4 sm:$0xff]  }
 0x1ff   :  { %2261 = vmatprep.subr.bf16.mxu0 %v3414_v57  ;;  %v3532_v57 = vld [vmem:[#allocation7 + $0x30] sm:$0xff]  }
 0x202   :  { %2262 = vmatpush1.bf16.msra.mxu0 %v3412_v58  ;;  %v3493_v58 = vld [vmem:[#allocation6 + $0x268] ss:$16 sps:$4 sm:$0xff]  }
 0x203   :  { %2263 = vmatprep.subr.bf16.mxu0 %v3420_v59  ;;  %v3498_v59 = vld [vmem:[#allocation6 + $0x24c] ss:$16 sps:$4 sm:$0xff]  }
 0x206   :  { %2264 = vmatpush1.bf16.msra.mxu0 %v3418_v60  ;;  %v3534_v60 = vld [vmem:[#allocation7 + $0x28] sm:$0xff]  }
 0x207   :  { %2265 = vmatprep.subr.bf16.mxu0 %v3426_v61  ;;  %v3535_v61 = vld [vmem:[#allocation7 + $0x60] sm:$0xff]  }
 0x20a   :  { %2266 = vmatpush1.bf16.msra.mxu0 %v3424_v62  ;;  %v3496_v62 = vld [vmem:[#allocation6 + $0x248] ss:$16 sps:$4 sm:$0xff]  }
 0x20b   :  { %2267 = vmatprep.subr.bf16.mxu0 %v3432_v63  ;;  %v3501_v63 = vld [vmem:[#allocation6 + $0x22c] ss:$16 sps:$4 sm:$0xff]  }
 0x20e   :  { %2268 = vmatpush1.bf16.msra.mxu0 %v3430_v0  ;;  %v3536_v0 = vld [vmem:[#allocation7 + $0x20] sm:$0xff]  }
 0x20f   :  { %2269 = vmatprep.subr.bf16.mxu0 %v3438_v1  ;;  %v3537_v1 = vld [vmem:[#allocation7 + $0x58] sm:$0xff]  }
 0x212   :  { %2270 = vmatpush2.bf16.msra.mxu0 %v3436_v2  ;;  %v3499_v2 = vld [vmem:[#allocation6 + $0x228] ss:$16 sps:$4 sm:$0xff]  }
 0x213   :  { %2271 = vmatprep.subr.bf16.mxu0 %v3444_v3  ;;  %v3504_v3 = vld [vmem:[#allocation6 + $0x20c] ss:$16 sps:$4 sm:$0xff]  }
 0x216   :  { %2272 = vmatpush2.bf16.msra.mxu0 %v3442_v4  ;;  %v3538_v4 = vld [vmem:[#allocation7 + $0x18] sm:$0xff]  }
 0x217   :  { %2273 = vmatprep.subr.bf16.mxu0 %v3450_v5  ;;  %v3502_v5 = vld [vmem:[#allocation6 + $0x208] ss:$16 sps:$4 sm:$0xff]  }
 0x21a   :  { %2274 = vmatpush2.bf16.msra.mxu0 %v3448_v6  ;;  %v3507_v6 = vld [vmem:[#allocation6 + $0x3ec] ss:$16 sps:$4 sm:$0xff]  }
 0x21b   :  { %2275 = vmatprep.subr.bf16.mxu0 %v3456_v7  ;;  %v3505_v7 = vld [vmem:[#allocation6 + $0x3e8] ss:$16 sps:$4 sm:$0xff]  }
 0x21e   :  { %2276 = vmatpush2.bf16.msra.mxu0 %v3454_v8  ;;  %v3510_v8 = vld [vmem:[#allocation6 + $0x3cc] ss:$16 sps:$4 sm:$0xff]  }
 0x21f   :  { %2277 = vmatprep.subr.bf16.mxu0 %v3462_v9  ;;  %v3508_v9 = vld [vmem:[#allocation6 + $0x3c8] ss:$16 sps:$4 sm:$0xff]  }
 0x221   :  { %v1313_v16 = vpop.f32.mrf.mxu0  ;;  %v1356_v17 = vpop.f32.mrf.mxu1 }
 0x222   :  { %2278 = vmatpush2.bf16.msra.mxu0 %v3460_v10  ;;  %v1314_v24 = vadd.f32 %v1313_v16, %v544_v15  ;;  %v3513_v10 = vld [vmem:[#allocation6 + $0x3ac] ss:$16 sps:$4 sm:$0xff]  }
 0x223   :  { %v1315_v19 = vpop.f32.mrf.mxu0  ;;  %v1358_v20 = vpop.f32.mrf.mxu1  ;;  %2279 = vmatprep.subr.bf16.mxu0 %v3468_v11  ;;  %v3511_v11 = vld [vmem:[#allocation6 + $0x3a8] ss:$16 sps:$4 sm:$0xff]   ;;  %v3519_v16 = vld [vmem:[#allocation6 + $0x36c] ss:$16 sps:$4 sm:$0xff]  }
 0x224   :  { %v1316_v22 = vadd.f32 %v1315_v19, %v548_v12  ;;  %v1357_v31 = vadd.f32 %v1356_v17, %v1314_v24  ;;  %v3517_v17 = vld [vmem:[#allocation6 + $0x368] ss:$16 sps:$4 sm:$0xff]  }
 0x225   :  { %v1317_v25 = vpop.f32.mrf.mxu0  ;;  %v1360_v26 = vpop.f32.mrf.mxu1  ;;  %v3520_v19 = vld [vmem:[#allocation6 + $0x348] ss:$16 sps:$4 sm:$0xff]  }
 0x226   :  { %v1318_v27 = vadd.f32 %v1317_v25, %v544_v15  ;;  %2280 = vmatpush2.bf16.msra.mxu0 %v3466_v18  ;;  %v1359_v29 = vadd.f32 %v1358_v20, %v1316_v22  ;;  %v1367_v38 = vmax.f32 %v1357_v31, 0.0  ;;  %v3514_v15 = vld [vmem:[#allocation6 + $0x388] ss:$16 sps:$4 sm:$0xff]   ;;  %v3522_v18 = vld [vmem:[#allocation6 + $0x34c] ss:$16 sps:$4 sm:$0xff]   ;;  %v3539_v25 = vld [vmem:[#allocation7 + $0x50] sm:$0xff]  }
 0x227   :  { %v1319_v13 = vpop.f32.mrf.mxu0  ;;  %2281 = vmatprep.subr.bf16.mxu0 %v3474_v21  ;;  %v1362_v32 = vpop.f32.mrf.mxu1  ;;  %v3525_v20 = vld [vmem:[#allocation6 + $0x32c] ss:$16 sps:$4 sm:$0xff]   ;;  %v3523_v21 = vld [vmem:[#allocation6 + $0x328] ss:$16 sps:$4 sm:$0xff]   ;;  %v3548_v31 = vld [vmem:[#allocation7 + $0xb0] sm:$0xff]  }
 0x228   :  { %v1361_v23 = vadd.f32 %v1360_v26, %v1318_v27  ;;  %v1320_v30 = vadd.f32 %v1319_v13, %v548_v12  ;;  %v1368_v36 = vmax.f32 %v1359_v29, 0.0  ;;  %v3516_v12 = vld [vmem:[#allocation6 + $0x38c] ss:$16 sps:$4 sm:$0xff]   ;;  %v3526_v24 = vld [vmem:[#allocation6 + $0x308] ss:$16 sps:$4 sm:$0xff]   ;;  %v3540_v26 = vld [vmem:[#allocation7 + $0x10] sm:$0xff]  }
 0x229   :  { %v3528_v22 = vld [vmem:[#allocation6 + $0x30c] ss:$16 sps:$4 sm:$0xff]   ;;  %v3543_v13 = vld [vmem:[#allocation7 + $0x40] sm:$0xff]  }
 0x22a   :  { %v1363_v33 = vadd.f32 %v1362_v32, %v1320_v30  ;;  %2282 = vmatpush2.bf16.msra.mxu0 %v3472_v28  ;;  %v1371_v35 = vmax.f32 %v1361_v23, 0.0  ;;  %v3541_v27 = vld [vmem:[#allocation7 + $0x48] sm:$0xff]   ;;  %v3545_v29 = vld [vmem:[#allocation7 + $0xf8] sm:$0xff]   ;;  %v3547_v30 = vld [vmem:[#allocation7 + $0xf0] sm:$0xff]  }
 0x22b   :  { %2283 = vmatprep.subr.bf16.mxu0 %v3480_v14  ;;  %v3542_v28 = vld [vmem:[#allocation7 + $0x8] sm:$0xff]   ;;  %v3544_v14 = vld [vmem:[#allocation7] sm:$0xff]   ;;  %v3546_v23 = vld [vmem:[#allocation7 + $0xb8] sm:$0xff]  }
 0x22c   :  { %v1372_v37 = vmax.f32 %v1363_v33, 0.0  ;;  %v3771_v45 = vpack.c.bf16 %v1371_v35, %v1367_v38  ;;  %v3549_v32 = vld [vmem:[#allocation7 + $0xe8] sm:$0xff]   ;;  %v3552_v35 = vld [vmem:[#allocation7 + $0xa0] sm:$0xff]   ;;  %v3555_v38 = vld [vmem:[#allocation7 + $0xd0] sm:$0xff]  }
 0x22d   :  { %v3550_v33 = vld [vmem:[#allocation7 + $0xa8] sm:$0xff]  }
 0x22e   :  { %v1376_v39 = vpack.c.bf16 %v1372_v37, %v1368_v36  ;;  %2284 = vmatpush2.bf16.msra.mxu0 %v3478_v34  ;;  %v3551_v34 = vld [vmem:[#allocation7 + $0xe0] sm:$0xff]   ;;  %v3553_v36 = vld [vmem:[#allocation7 + $0xd8] sm:$0xff]  }
 0x22f   :  { %3044 = vmatprep.subr.bf16.mxu0 %v3529_v52  ;;  %v3554_v37 = vld [vmem:[#allocation7 + $0x98] sm:$0xff]  }
 0x230   :  { %2242 = vmatprep.mubr.bf16.mxu1 %v1376_v39 }
 0x231   :  { %2243 = vmatmul.mubr.bf16.vlgmr.msra.gmra.mxu1 %v3771_v45  ;;  %2286 = vmatmul.mubr.bf16.vlgmr.msra.gmra.mxu0 %v3764_v50  ;;  %v3533_v50 = vld [vmem:[#allocation7 + $0x68] sm:$0xff]  }
 0x232   :  { %2297 = vmatpush1.bf16.msra.mxu1 %v3481_v44  ;;  %2328 = vmatprep.mubr.bf16.mxu1 %v1376_v39  ;;  %v3556_v39 = vld [vmem:[#allocation7 + $0x90] sm:$0xff]   ;;  %v3557_v44 = vld [vmem:[#allocation7 + $0xc8] sm:$0xff]  }
 0x233   :  { %2298 = vmatprep.subr.bf16.mxu1 %v3486_v46  ;;  %3045 = vmatpush3.bf16.msra.mxu0 %v3530_v53  ;;  %v3559_v46 = vld [vmem:[#allocation7 + $0xc0] sm:$0xff]  }
 0x234   :  { %3046 = vmatprep.subr.bf16.mxu0 %v3531_v54 }
 0x236   :  { %2299 = vmatpush1.bf16.msra.mxu1 %v3484_v47  ;;  %v3560_v47 = vld [vmem:[#allocation7 + $0x80] sm:$0xff]  }
 0x237   :  { %2300 = vmatprep.subr.bf16.mxu1 %v3489_v48  ;;  %3047 = vmatpush3.bf16.msra.mxu0 %v3532_v57 }
 0x238   :  { %3048 = vmatprep.subr.bf16.mxu0 %v3533_v50 }
 0x23a   :  { %2301 = vmatpush1.bf16.msra.mxu1 %v3487_v49 }
 0x23b   :  { %2302 = vmatprep.subr.bf16.mxu1 %v3492_v51  ;;  %3049 = vmatpush3.bf16.msra.mxu0 %v3534_v60  ;;  %v1505_v51 = vld [vmem:[%s3798_s6] sm:$0xf] }
 0x23c   :  { %3050 = vmatprep.subr.bf16.mxu0 %v3535_v61  ;;  %v1514_v53 = vrot.slane %v1505_v51, %v3732_v40  ;;  %v1510_v54 = vrot.slane %v1505_v51, %v3736_v42 }
 0x23e   :  { %2303 = vmatpush1.bf16.msra.mxu1 %v3490_v55 }
 0x23f   :  { %2304 = vmatprep.subr.bf16.mxu1 %v3495_v56  ;;  %3051 = vmatpush3.bf16.msra.mxu0 %v3536_v0 }
 0x240   :  { %3052 = vmatprep.subr.bf16.mxu0 %v3537_v1 }
 0x242   :  { %2305 = vmatpush1.bf16.msra.mxu1 %v3493_v58 }
 0x243   :  { %2306 = vmatprep.subr.bf16.mxu1 %v3498_v59  ;;  %3053 = vmatpush3.bf16.msra.mxu0 %v3538_v4 }
 0x244   :  { %3054 = vmatprep.subr.bf16.mxu0 %v3539_v25 }
 0x246   :  { %2307 = vmatpush1.bf16.msra.mxu1 %v3496_v62 }
 0x247   :  { %2308 = vmatprep.subr.bf16.mxu1 %v3501_v63  ;;  %3055 = vmatpush3.bf16.msra.mxu0 %v3540_v26 }
 0x248   :  { %3056 = vmatprep.subr.bf16.mxu0 %v3541_v27 }
 0x24a   :  { %2309 = vmatpush1.bf16.msra.mxu1 %v3499_v2 }
 0x24b   :  { %2310 = vmatprep.subr.bf16.mxu1 %v3504_v3  ;;  %3057 = vmatpush3.bf16.msra.mxu0 %v3542_v28 }
 0x24c   :  { %3058 = vmatprep.subr.bf16.mxu0 %v3543_v13 }
 0x24e   :  { %2311 = vmatpush1.bf16.msra.mxu1 %v3502_v5 }
 0x24f   :  { %2312 = vmatprep.subr.bf16.mxu1 %v3507_v6  ;;  %3059 = vmatpush3.bf16.msra.mxu0 %v3544_v14 }
 0x252   :  { %2313 = vmatpush2.bf16.msra.mxu1 %v3505_v7 }
 0x253   :  { %2314 = vmatprep.subr.bf16.mxu1 %v3510_v8 }
 0x256   :  { %2315 = vmatpush2.bf16.msra.mxu1 %v3508_v9 }
 0x257   :  { %2316 = vmatprep.subr.bf16.mxu1 %v3513_v10  ;;  %v1522_v10 = vrot.slane %v1505_v51, %v3734_v41 }
 0x25a   :  { %2317 = vmatpush2.bf16.msra.mxu1 %v3511_v11  ;;  %v1518_v11 = vrot.slane %v1505_v51, %v3738_v43 }
 0x25b   :  { %2318 = vmatprep.subr.bf16.mxu1 %v3516_v12 }
 0x25e   :  { %2319 = vmatpush2.bf16.msra.mxu1 %v3514_v15 }
 0x25f   :  { %2320 = vmatprep.subr.bf16.mxu1 %v3519_v16 }
 0x262   :  { %2321 = vmatpush2.bf16.msra.mxu1 %v3517_v17 }
 0x263   :  { %2322 = vmatprep.subr.bf16.mxu1 %v3522_v18 }
 0x266   :  { %2323 = vmatpush2.bf16.msra.mxu1 %v3520_v19 }
 0x267   :  { %2324 = vmatprep.subr.bf16.mxu1 %v3525_v20 }
 0x26a   :  { %2325 = vmatpush2.bf16.msra.mxu1 %v3523_v21 }
 0x26b   :  { %2326 = vmatprep.subr.bf16.mxu1 %v3528_v22 }
 0x26e   :  { %2327 = vmatpush2.bf16.msra.mxu1 %v3526_v24 }
 0x26f   :  { %3066 = vmatprep.subr.bf16.mxu1 %v3545_v29 }
 0x271   :  { %2329 = vmatmul.mubr.bf16.vlgmr.msra.gmra.mxu1 %v3771_v45  ;;  %v3558_v45 = vld [vmem:[#allocation7 + $0x88] sm:$0xff]  }
 0x272   :  { %3067 = vmatpush3.bf16.msra.mxu1 %v3546_v23 }
 0x273   :  { %3068 = vmatprep.subr.bf16.mxu1 %v3547_v30 }
 0x276   :  { %3069 = vmatpush3.bf16.msra.mxu1 %v3548_v31 }
 0x277   :  { %3070 = vmatprep.subr.bf16.mxu1 %v3549_v32 }
 0x27a   :  { %3071 = vmatpush3.bf16.msra.mxu1 %v3550_v33  ;;  %v3011_v33 = vld [vmem:[%s3800_s8] ss:$0 sm:$0xff] }
 0x27b   :  { %3072 = vmatprep.subr.bf16.mxu1 %v3551_v34 }
 0x27e   :  { %3073 = vmatpush3.bf16.msra.mxu1 %v3552_v35 }
 0x27f   :  { %3074 = vmatprep.subr.bf16.mxu1 %v3553_v36 }
 0x282   :  { %3075 = vmatpush3.bf16.msra.mxu1 %v3554_v37 }
 0x283   :  { %3076 = vmatprep.subr.bf16.mxu1 %v3555_v38 }
 0x286   :  { %3077 = vmatpush3.bf16.msra.mxu1 %v3556_v39 }
 0x287   :  { %3078 = vmatprep.subr.bf16.mxu1 %v3557_v44 }
 0x28a   :  { %3079 = vmatpush3.bf16.msra.mxu1 %v3558_v45 }
 0x28b   :  { %3080 = vmatprep.subr.bf16.mxu1 %v3559_v46 }
 0x28e   :  { %3081 = vmatpush3.bf16.msra.mxu1 %v3560_v47 }
 0x2b1   :  { %v2201_v48 = vpop.f32.mrf.mxu0 }
 0x2b2   :  { %v2202_v59 = vadd.f32 %v2201_v48, %v1510_v54 }
 0x2b3   :  { %v2203_v49 = vpop.f32.mrf.mxu0 }
 0x2b4   :  { %v2204_v50 = vadd.f32 %v2203_v49, %v1514_v53 }
 0x2b5   :  { %v2205_v52 = vpop.f32.mrf.mxu0 }
 0x2b6   :  { %v2206_v58 = vadd.f32 %v2205_v52, %v1510_v54 }
 0x2b7   :  { %v2207_v56 = vpop.f32.mrf.mxu0 }
 0x2b8   :  { %v2208_v61 = vadd.f32 %v2207_v56, %v1514_v53 }
 0x2f1   :  { %v2244_v55 = vpop.f32.mrf.mxu1  ;;  %v2287_v42 = vpop.f32.mrf.mxu0 }
 0x2f2   :  { %v2245_v0 = vadd.f32 %v2244_v55, %v2202_v59  ;;  %v2288_v19 = vadd.f32 %v2287_v42, %v1518_v11 }
 0x2f3   :  { %v2246_v57 = vpop.f32.mrf.mxu1  ;;  %v2289_v8 = vpop.f32.mrf.mxu0 }
 0x2f4   :  { %v2247_v62 = vadd.f32 %v2246_v57, %v2204_v50  ;;  %v2339_v6 = vmax.f32 %v2245_v0, 0.0  ;;  %v2290_v17 = vadd.f32 %v2289_v8, %v1522_v10 }
 0x2f5   :  { %v2248_v60 = vpop.f32.mrf.mxu1  ;;  %v2291_v9 = vpop.f32.mrf.mxu0 }
 0x2f6   :  { %v2249_v63 = vadd.f32 %v2248_v60, %v2206_v58  ;;  %v2340_v4 = vmax.f32 %v2247_v62, 0.0  ;;  %v2292_v18 = vadd.f32 %v2291_v9, %v1518_v11 }
 0x2f7   :  { %v2250_v1 = vpop.f32.mrf.mxu1  ;;  %v2293_v15 = vpop.f32.mrf.mxu0 }
 0x2f8   :  { %v2251_v2 = vadd.f32 %v2250_v1, %v2208_v61  ;;  %v2343_v3 = vmax.f32 %v2249_v63, 0.0  ;;  %v2294_v21 = vadd.f32 %v2293_v15, %v1522_v10 }
 0x2fa   :  { %v2344_v5 = vmax.f32 %v2251_v2, 0.0  ;;  %v2347_v7 = vpack.c.bf16 %v2343_v3, %v2339_v6 }
 0x2fc   :  { %v2348_v40 = vpack.c.bf16 %v2344_v5, %v2340_v4 }
 0x2fe   :  { %2646 = vmatprep.mubr.bf16.mxu0 %v2348_v40 }
 0x2ff   :  { %2647 = vmatmul.mubr.bf16.vlgmr.msra.gmra.mxu0 %v2347_v7 }
 0x331   :  { %v2330_v12 = vpop.f32.mrf.mxu1 }
 0x332   :  { %v2331_v25 = vadd.f32 %v2330_v12, %v2288_v19 }
 0x333   :  { %v2332_v16 = vpop.f32.mrf.mxu1 }
 0x334   :  { %v2333_v22 = vadd.f32 %v2332_v16, %v2290_v17  ;;  %v2341_v29 = vmax.f32 %v2331_v25, 0.0 }
 0x335   :  { %v2334_v20 = vpop.f32.mrf.mxu1 }
 0x336   :  { %v2335_v24 = vadd.f32 %v2334_v20, %v2292_v18  ;;  %v2342_v13 = vmax.f32 %v2333_v22, 0.0 }
 0x337   :  { %v2336_v26 = vpop.f32.mrf.mxu1 }
 0x338   :  { %v2337_v27 = vadd.f32 %v2336_v26, %v2294_v21  ;;  %v2345_v28 = vmax.f32 %v2335_v24, 0.0 }
 0x33a   :  { %v2346_v14 = vmax.f32 %v2337_v27, 0.0  ;;  %v2349_v23 = vpack.c.bf16 %v2345_v28, %v2341_v29 }
 0x33c   :  { %v2350_v41 = vpack.c.bf16 %v2346_v14, %v2342_v13 }
 0x33e   :  { %2687 = vmatprep.mubr.bf16.mxu1 %v2350_v41 }
 0x33f   :  { %2688 = vmatmul.mubr.bf16.vlgmr.msra.gmra.mxu1 %v2349_v23 }
 0x3bf   :  { %v3060_v43 = vpop.f32.mrf.mxu0 }
 0x3c1   :  { %v3061_v30 = vpop.f32.mrf.mxu0 }
 0x3c2   :  { %v3062_v32 = vadd.f32 %v3061_v30, %v3060_v43 }
 0x3c3   :  { %v3063_v31 = vpop.f32.mrf.mxu0 }
 0x3c4   :  { %v2649_v37 = vadd.f32 %v3062_v32, %v3011_v33 }
 0x3c5   :  { %v3064_v34 = vpop.f32.mrf.mxu0 }
 0x3c6   :  { %v3065_v38 = vadd.f32 %v3064_v34, %v3063_v31 }
 0x3c8   :  { %v2652_v47 = vadd.f32 %v3065_v38, %v3011_v33 }
 0x3ff   :  { %v3082_v35 = vpop.f32.mrf.mxu1 }
 0x401   :  { %v3083_v36 = vpop.f32.mrf.mxu1 }
 0x402   :  { %v3084_v39 = vadd.f32 %v3083_v36, %v3082_v35 }
 0x403   :  { %v3085_v44 = vpop.f32.mrf.mxu1 }
 0x404   :  { %v2690_v45 = vadd.f32 %v3084_v39, %v2649_v37 }
 0x405   :  { %v3086_v46 = vpop.f32.mrf.mxu1 }
 0x406   :  { %v3087_v48 = vadd.f32 %v3086_v46, %v3085_v44  ;;  %2696 = vmax.xlane.f32.xlu0 %v2690_v45 }
 0x408   :  { %v2693_v49 = vadd.f32 %v3087_v48, %v2652_v47 }
 0x40a   :  { %2698 = vmax.xlane.f32.xlu0 %v2693_v49 }
 0x48f   :  { %v2697_v51 = vpop.xlane.xlu0 %2696 }
 0x490   :  { %v2700_v52 = vsub.f32 %v2690_v45, %v2697_v51 }
 0x492   :  { %v2702_v53 = vmul.f32 1.442695, %v2700_v52 }
 0x493   :  { %v2699_v54 = vpop.xlane.xlu0 %2698 }
 0x494   :  { %3561 = vpow2.f32 %v2702_v53  ;;  %v2701_v55 = vsub.f32 %v2693_v49, %v2699_v54 }
 0x496   :  { %v2704_v56 = vmul.f32 1.442695, %v2701_v55 }
 0x498   :  { %3563 = vpow2.f32 %v2704_v56 }
 0x4a1   :  { %v3562_v57 = vpop.eup %3561 }
 0x4a2   :  { %2706 = vadd.xlane.f32.xlu1 %v3562_v57 }
 0x4a5   :  { %v3564_v50 = vpop.eup %3563 }
 0x4a6   :  { %2708 = vadd.xlane.f32.xlu1 %v3564_v50 }
 0x52b   :  { %v2707_v58 = vpop.xlane.xlu1 %2706 }
 0x52c   :  { %3565 = vrcp.f32 %v2707_v58 }
 0x52f   :  { %v2709_v59 = vpop.xlane.xlu1 %2708 }
 0x530   :  { %3567 = vrcp.f32 %v2709_v59 }
 0x539   :  { %v3566_v60 = vpop.eup %3565 }
 0x53a   :  { %v2711_v61 = vmul.f32 %v3566_v60, %v3562_v57 }
 0x53c   :  { %2714 = vst [vmem:[%s3801_s9] sm:$0xff] %v2711_v61 }
 0x53d   :  { %v3568_v62 = vpop.eup %3567 }
 0x53e   :  { %v2713_v63 = vmul.f32 %v3568_v62, %v3564_v50 }
 0x540   :  { %2715 = vst [vmem:[%s3801_s9 + $0x8] sm:$0xff] %v2713_v63 }
 0x541   :  { %2720 = vsyncpa [#allocation3], 1 }
 0x542   :  { %2721 = vsyncpa [#allocation5], 1 }
 0x543   :  { %2722 = vsyncpa [#allocation8], 1 }

</bundles_post_ra>
